<compile_context>
chip_gen: v5e
topology: v5e:2x2
jax: 0.10.0
libtpu: 0.0.40
codegen_flags: <defaults>
</compile_context>

<pallas_src>
import functools

import jax
import jax.numpy as jnp
from jax import lax
from jax.experimental import pallas as pl
from jax.experimental.pallas import tpu as pltpu

VMEM = pltpu.MemorySpace.VMEM
LANE = 128  # every feature dim is zero-padded to this lane width


# ----------------------------------------------------------------------------
# Fused whole-forward kernel
# ----------------------------------------------------------------------------
def _codebook_kernel(*refs, num_layers, n, d_in, d_h, k, d_pad,
                     commitment_cost, sce_scale):
    f32 = jnp.float32
    bf16 = jnp.bfloat16

    it = iter(refs)
    x_ref = next(it)                                            # [N, d_pad]   f32
    a_ref = next(it)                                            # [3N, N]      bf16
    mask_row_ref = next(it)                                     # [1, K]       f32
    enc = [(next(it), next(it), next(it), next(it))             # Wvert bf16 [3d,d],
           for _ in range(num_layers)]                          # b, gamma, beta [1,d]
    wn_ref = next(it)                                           # [K, d_pad]   f32
    wnt_ref = next(it)                                          # [d_pad, K]   f32
    dec_w = [(next(it), next(it)) for _ in range(num_layers)]   # Wvert bf16, b
    dec_bn = [(next(it), next(it)) for _ in range(num_layers - 1)]
    z_ref = next(it)                                            # [N, d_pad]   f32
    e_ref = next(it)                                            # [N, d_pad]   f32
    loss_ref = next(it)                                         # [1, d_pad]   f32

    a_s = a_ref[...]                                            # bf16, loaded once

    def a_apply(h):                      # sum-free relation aggregation: [3N, lanes]
        return jnp.dot(a_s, h.astype(bf16), preferred_element_type=f32)

    def mm(act, w_bf16):                 # bf16 MXU inputs, f32 accumulation
        return jnp.dot(act.astype(bf16), w_bf16, preferred_element_type=f32)

    def stack3(ah, c0, c1):              # [3N, *] row blocks -> [N, 3*d_pad] lanes
        return jnp.concatenate(
            [ah[0:n, c0:c1], ah[n:2 * n, c0:c1], ah[2 * n:3 * n, c0:c1]], axis=1)

    def bn(y, g, b_):                    # BatchNorm1d, training-mode batch stats
        mu = jnp.mean(y, axis=0, keepdims=True)
        var = jnp.mean((y - mu) * (y - mu), axis=0, keepdims=True)
        return g * (y - mu) * lax.rsqrt(var + 1e-5) + b_

    def fullsum(v):                      # -> (1, 1)
        return jnp.sum(jnp.sum(v, axis=1, keepdims=True), axis=0, keepdims=True)

    # ---------------- GCN encoder (conv+fc folded) ----------------
    h = x_ref[...]
    for l in range(num_layers):
        w_ref, b_ref, g_ref, be_ref = enc[l]
        ah = a_apply(h)                                          # [3N, d_pad]
        y = mm(stack3(ah, 0, d_pad), w_ref[...]) + b_ref[...]    # conv+fc folded
        y = jnp.maximum(y, 0.0)                                  # ReLU
        h = bn(y, g_ref[...], be_ref[...])                       # BatchNorm
        # dropout_ratio == 0.0 -> identity
    z = h
    z_ref[...] = z

    # ---------------- Vector quantizer ----------------
    eps2 = 1e-24                                                 # (F.normalize eps)^2
    xn = z * lax.rsqrt(jnp.maximum(jnp.sum(z * z, axis=-1, keepdims=True), eps2))
    score = jnp.dot(xn, wnt_ref[...], preferred_element_type=f32)   # [N, K]  f32
    col_i = lax.broadcasted_iota(jnp.int32, (n, k), 1)
    smax = jnp.max(score, axis=1, keepdims=True)
    idx_f = jnp.min(jnp.where(score >= smax, col_i.astype(f32), float(k)),
                    axis=1, keepdims=True)                       # first-min tie-break
    onehot = (col_i == idx_f.astype(jnp.int32)).astype(f32)      # [N, K]

    quant = jnp.dot(onehot, wn_ref[...], preferred_element_type=f32)   # [N, d_pad]
    mask_row = jnp.sum(onehot * mask_row_ref[...], axis=1, keepdims=True)  # [N, 1]
    e_masked = quant * (1.0 - mask_row)

    dq = quant - xn
    e_q_loss = (1.0 + commitment_cost) * fullsum(dq * dq) / float(n * d_h)
    e_ref[...] = e_masked

    # -------- GCN decoder: both passes carried lane-concatenated [N, 2*d_pad] --------
    hl = jnp.concatenate([quant, e_masked], axis=1)
    x_recon = quant
    x_mask_recon = e_masked
    for l in range(num_layers):
        w_ref, b_ref = dec_w[l]
        wv = w_ref[...]
        bb = b_ref[...]
        ah = a_apply(hl)                                         # [3N, 2*d_pad]
        y0 = mm(stack3(ah, 0, d_pad), wv) + bb                   # pass 0 (e)
        y1 = mm(stack3(ah, d_pad, 2 * d_pad), wv) + bb           # pass 1 (e_masked)
        if l != num_layers - 1:
            g_ref, be_ref = dec_bn[l]
            g = g_ref[...]
            be = be_ref[...]
            y0 = bn(jnp.maximum(y0, 0.0), g, be)                 # per-pass batch stats
            y1 = bn(jnp.maximum(y1, 0.0), g, be)
            hl = jnp.concatenate([y0, y1], axis=1)
        else:
            x_recon = y0
            x_mask_recon = y1

    # ---------------- losses ----------------
    x_orig = x_ref[...]
    dr = x_recon - x_orig
    recon = fullsum(dr * dr) / float(n * d_in)

    def l2n(v):
        return v * lax.rsqrt(jnp.maximum(jnp.sum(v * v, axis=-1, keepdims=True), eps2))

    cos = jnp.sum(l2n(x_mask_recon) * l2n(x_orig), axis=-1, keepdims=True)   # [N, 1]
    base = 1.0 - cos
    if float(sce_scale) == float(int(sce_scale)) and int(sce_scale) >= 1:
        p = base
        for _ in range(int(sce_scale) - 1):
            p = p * base
    else:
        p = jnp.power(jnp.maximum(base, 0.0), sce_scale)
    num = fullsum(p * mask_row)
    den = fullsum(mask_row) + 1e-12                              # (#masked nodes)+eps
    mask_loss = num / den

    lane1 = lax.broadcasted_iota(jnp.int32, (1, d_pad), 1)
    loss_ref[...] = (jnp.where(lane1 == 0, e_q_loss, 0.0)
                     + jnp.where(lane1 == 1, recon, 0.0)
                     + jnp.where(lane1 == 2, mask_loss, 0.0))


# ----------------------------------------------------------------------------
# Parameter packing (one-time, outside jit): fold fc into conv, pad to 128 lanes,
# pre-cast matmul weights to bf16, pre-normalize/transpose the codebook.
# ----------------------------------------------------------------------------
def _pad2(a, rows, cols):
    return jnp.pad(a, ((0, rows - a.shape[0]), (0, cols - a.shape[1])))


def pack_params(params, param):
    L = param['prot_num_layers']
    k = param['num_embeddings']
    d_pad = LANE

    def fold(conv, fc):
        # (A@(H@W_r)+b_conv)@W_fc + b_fc  ==  A@(H@(W_r@W_fc)) + (b_conv@W_fc + b_fc)
        wf = [w @ fc['W'] for w in conv['W']]
        bf = conv['b'] @ fc['W'] + fc['b']
        wvert = jnp.concatenate([_pad2(w, d_pad, d_pad) for w in wf], axis=0)
        return wvert.astype(jnp.bfloat16), _pad2(bf, 1, d_pad)

    flat = []
    for l in range(L):
        wv, b = fold(params['enc_conv'][l], params['enc_fc'][l])
        bnp = params['enc_bn'][l]
        flat += [wv, b, _pad2(bnp['gamma'], 1, d_pad), _pad2(bnp['beta'], 1, d_pad)]

    emb = params['emb']
    wn = emb / jnp.maximum(jnp.linalg.norm(emb, axis=1, keepdims=True), 1e-12)
    wn_pad = _pad2(wn, k, d_pad)                          # f32: VQ path stays f32
    flat += [wn_pad, jnp.asarray(wn_pad.T)]

    for l in range(L):
        wv, b = fold(params['dec_conv'][l], params['dec_fc'][l])
        flat += [wv, b]
    for l in range(L - 1):
        bnp = params['dec_bn'][l]
        flat += [_pad2(bnp['gamma'], 1, d_pad), _pad2(bnp['beta'], 1, d_pad)]
    return flat


# ----------------------------------------------------------------------------
# Full CodeBook forward: one pallas_call
# ----------------------------------------------------------------------------
def codebook_forward(packed, x, a_stack, mask_codes, param):
    L = int(param['prot_num_layers'])
    d_in = int(param['input_dim'])
    d_h = int(param['prot_hidden_dim'])
    k = int(param['num_embeddings'])
    n = x.shape[0]
    d_pad = LANE

    x_pad = jnp.pad(x, ((0, 0), (0, d_pad - d_in)))
    mask_row = mask_codes.reshape(1, k).astype(jnp.float32)
    ops = [x_pad, a_stack, mask_row] + list(packed)

    # rough cost hint so XLA can schedule around the fused custom call
    a_fl = lambda lanes: 2 * (3 * n) * n * lanes
    w_fl = 2 * n * (3 * d_pad) * d_pad
    flops = L * (a_fl(d_pad) + w_fl) + L * (a_fl(2 * d_pad) + 2 * w_fl)
    flops += 2 * n * d_pad * k + 2 * n * k * d_pad
    bytes_acc = sum(int(o.size) * o.dtype.itemsize for o in ops) \
        + (2 * n * d_pad + d_pad) * 4
    cost = pl.CostEstimate(flops=int(flops), transcendentals=int(8 * n + 4 * n * L),
                           bytes_accessed=int(bytes_acc))

    kern = functools.partial(
        _codebook_kernel, num_layers=L, n=n, d_in=d_in, d_h=d_h, k=k, d_pad=d_pad,
        commitment_cost=float(param['commitment_cost']),
        sce_scale=float(param['sce_scale']))

    z_pad, e_pad, losses = pl.pallas_call(
        kern,
        out_shape=(jax.ShapeDtypeStruct((n, d_pad), jnp.float32),
                   jax.ShapeDtypeStruct((n, d_pad), jnp.float32),
                   jax.ShapeDtypeStruct((1, d_pad), jnp.float32)),
        in_specs=[pl.BlockSpec(memory_space=VMEM)] * len(ops),
        out_specs=(pl.BlockSpec(memory_space=VMEM),) * 3,
        cost_estimate=cost,
    )(*ops)

    z = z_pad[:, :d_h]
    e = e_pad[:, :d_h]
    return z, e, losses[0, 0], losses[0, 1], losses[0, 2]


# ----------------------------------------------------------------------------
# Deterministic parameter / input construction
# ----------------------------------------------------------------------------
def _w(key, shape, scale=0.1):
    return scale * jax.random.normal(key, shape, dtype=jnp.float32)


def init_params(key, param):
    h = param['prot_hidden_dim']
    din = param['input_dim']
    k = param['num_embeddings']
    nl = param['prot_num_layers']
    keys = iter(jax.random.split(key, 256))

    def conv_layer(d_in, d_out):
        ws = [_w(next(keys), (d_in, d_out)) for _ in range(3)]
        bs = sum(_w(next(keys), (1, d_out), 0.02) for _ in range(3))
        return {'W': ws, 'b': bs}

    def fc_layer(d_in, d_out):
        return {'W': _w(next(keys), (d_in, d_out)), 'b': _w(next(keys), (1, d_out), 0.02)}

    def bn_layer(d):
        return {'gamma': jnp.ones((1, d), jnp.float32), 'beta': jnp.zeros((1, d), jnp.float32)}

    params = {
        'enc_conv': [conv_layer(din, h)] + [conv_layer(h, h) for _ in range(nl - 1)],
        'enc_fc':   [fc_layer(h, h) for _ in range(nl)],
        'enc_bn':   [bn_layer(h) for _ in range(nl)],
        'dec_conv': [conv_layer(h, h) for _ in range(nl)],
        'dec_fc':   [fc_layer(h, h) for _ in range(nl - 1)] + [fc_layer(h, din)],
        'dec_bn':   [bn_layer(h) for _ in range(nl - 1)],
        'emb':      jax.random.normal(next(keys), (k, h), dtype=jnp.float32),
    }
    return params


def normalize_adj(a):
    deg = jnp.clip(jnp.sum(a, axis=1), 1.0, None)
    dinv = 1.0 / jnp.sqrt(deg)
    return a * dinv[:, None] * dinv[None, :]


def build_graphs(key, n):
    # SEQ: peptide-chain graph (i <-> i+1); KNN / DIS: deterministic random graphs.
    idx = jnp.arange(n - 1)
    a_seq = jnp.zeros((n, n), jnp.float32).at[idx, idx + 1].set(1.0).at[idx + 1, idx].set(1.0)
    k1, k2 = jax.random.split(key)

    def rand_sym(kk):
        r = (jax.random.uniform(kk, (n, n)) < 0.2).astype(jnp.float32)
        a = jnp.clip(r + r.T, 0.0, 1.0)
        return a * (1.0 - jnp.eye(n, dtype=jnp.float32))

    a_stack = jnp.concatenate([normalize_adj(a_seq),
                               normalize_adj(rand_sym(k1)),
                               normalize_adj(rand_sym(k2))], axis=0)   # [3N, N]
    return a_stack.astype(jnp.bfloat16)                                # pre-cast once


if __name__ == "__main__":
    param = dict(prot_num_layers=2, prot_hidden_dim=32, input_dim=16,
                 num_embeddings=64, commitment_cost=0.25, mask_ratio=0.25,
                 dropout_ratio=0.0, sce_scale=2.0)
    N = 32

    root = jax.random.PRNGKey(0)
    k_param, k_x, k_graph, k_mask = jax.random.split(root, 4)

    params = init_params(k_param, param)
    packed = pack_params(params, param)          # one-time fold / pad / bf16 cast
    x = jax.random.normal(k_x, (N, param['input_dim']), dtype=jnp.float32)
    a_stack = build_graphs(k_graph, N)
    # torch.bernoulli(full((num_embeddings,), mask_ratio)) -> deterministic jax equivalent
    mask_codes = jax.random.bernoulli(
        k_mask, param['mask_ratio'], (param['num_embeddings'],)).astype(jnp.float32)

    fwd = jax.jit(lambda pk, xx, aa, mm: codebook_forward(pk, xx, aa, mm, param))
    z, e, e_q_loss, recon_loss, mask_loss = fwd(packed, x, a_stack, mask_codes)
    jax.block_until_ready((z, e, e_q_loss, recon_loss, mask_loss))
    print("KERNEL_OK")
</pallas_src>

<mosaic_0001>
module attributes {stable_mosaic.version = 11 : i64} {
  func.func @_codebook_kernel(%arg0: memref<32x128xf32, #tpu.memory_space<vmem>>, %arg1: memref<96x32xbf16, #tpu.memory_space<vmem>>, %arg2: memref<1x64xf32, #tpu.memory_space<vmem>>, %arg3: memref<384x128xbf16, #tpu.memory_space<vmem>>, %arg4: memref<1x128xf32, #tpu.memory_space<vmem>>, %arg5: memref<1x128xf32, #tpu.memory_space<vmem>>, %arg6: memref<1x128xf32, #tpu.memory_space<vmem>>, %arg7: memref<384x128xbf16, #tpu.memory_space<vmem>>, %arg8: memref<1x128xf32, #tpu.memory_space<vmem>>, %arg9: memref<1x128xf32, #tpu.memory_space<vmem>>, %arg10: memref<1x128xf32, #tpu.memory_space<vmem>>, %arg11: memref<64x128xf32, #tpu.memory_space<vmem>>, %arg12: memref<128x64xf32, #tpu.memory_space<vmem>>, %arg13: memref<384x128xbf16, #tpu.memory_space<vmem>>, %arg14: memref<1x128xf32, #tpu.memory_space<vmem>>, %arg15: memref<384x128xbf16, #tpu.memory_space<vmem>>, %arg16: memref<1x128xf32, #tpu.memory_space<vmem>>, %arg17: memref<1x128xf32, #tpu.memory_space<vmem>>, %arg18: memref<1x128xf32, #tpu.memory_space<vmem>>, %arg19: memref<32x128xf32, #tpu.memory_space<vmem>>, %arg20: memref<32x128xf32, #tpu.memory_space<vmem>>, %arg21: memref<1x128xf32, #tpu.memory_space<vmem>>) attributes {dimension_semantics = [], scalar_prefetch = 0 : i64, scratch_operands = 0 : i64, tpu.core_type = #tpu.core_type<tc>} {
    %c0 = arith.constant 0 : index
    %c0_0 = arith.constant 0 : index
    %0 = vector.load %arg1[%c0, %c0_0] : memref<96x32xbf16, #tpu.memory_space<vmem>>, vector<96x32xbf16>
    %c0_1 = arith.constant 0 : index
    %c0_2 = arith.constant 0 : index
    %1 = vector.load %arg0[%c0_1, %c0_2] : memref<32x128xf32, #tpu.memory_space<vmem>>, vector<32x128xf32>
    %2 = arith.truncf %1 : vector<32x128xf32> to vector<32x128xbf16>
    %cst = arith.constant dense<0.000000e+00> : vector<96x128xf32>
    %3 = tpu.matmul %0, %2, %cst {dimension_numbers = #tpu.dot_dimension_numbers<[1], [0], [0], [1], [0, 0, 1, 1], [], []>} : vector<96x32xbf16>, vector<32x128xbf16>, vector<96x128xf32> -> vector<96x128xf32>
    %4 = vector.extract_strided_slice %3 {offsets = [0, 0], sizes = [32, 128], strides = [1, 1]} : vector<96x128xf32> to vector<32x128xf32>
    %5 = vector.extract_strided_slice %3 {offsets = [32, 0], sizes = [32, 128], strides = [1, 1]} : vector<96x128xf32> to vector<32x128xf32>
    %6 = vector.extract_strided_slice %3 {offsets = [64, 0], sizes = [32, 128], strides = [1, 1]} : vector<96x128xf32> to vector<32x128xf32>
    %7 = tpu.concatenate %4, %5, %6 in 1 : vector<32x128xf32>, vector<32x128xf32>, vector<32x128xf32> -> vector<32x384xf32>
    %c0_3 = arith.constant 0 : index
    %c0_4 = arith.constant 0 : index
    %8 = vector.load %arg3[%c0_3, %c0_4] : memref<384x128xbf16, #tpu.memory_space<vmem>>, vector<384x128xbf16>
    %9 = arith.truncf %7 : vector<32x384xf32> to vector<32x384xbf16>
    %cst_5 = arith.constant dense<0.000000e+00> : vector<32x128xf32>
    %10 = tpu.matmul %9, %8, %cst_5 {dimension_numbers = #tpu.dot_dimension_numbers<[1], [0], [0], [1], [0, 0, 1, 1], [], []>} : vector<32x384xbf16>, vector<384x128xbf16>, vector<32x128xf32> -> vector<32x128xf32>
    %c0_6 = arith.constant 0 : index
    %c0_7 = arith.constant 0 : index
    %11 = vector.load %arg4[%c0_6, %c0_7] : memref<1x128xf32, #tpu.memory_space<vmem>>, vector<1x128xf32>
    %12 = vector.broadcast %11 : vector<1x128xf32> to vector<32x128xf32>
    %13 = arith.addf %10, %12 : vector<32x128xf32>
    %cst_8 = arith.constant 0.000000e+00 : f32
    %14 = vector.broadcast %cst_8 : f32 to vector<32x128xf32>
    %15 = arith.maximumf %13, %14 : vector<32x128xf32>
    %c0_9 = arith.constant 0 : index
    %c0_10 = arith.constant 0 : index
    %16 = vector.load %arg5[%c0_9, %c0_10] : memref<1x128xf32, #tpu.memory_space<vmem>>, vector<1x128xf32>
    %c0_11 = arith.constant 0 : index
    %c0_12 = arith.constant 0 : index
    %17 = vector.load %arg6[%c0_11, %c0_12] : memref<1x128xf32, #tpu.memory_space<vmem>>, vector<1x128xf32>
    %cst_13 = arith.constant dense<0.000000e+00> : vector<128xf32>
    %18 = vector.multi_reduction <add>, %15, %cst_13 [0] : vector<32x128xf32> to vector<128xf32>
    %19 = vector.shape_cast %18 : vector<128xf32> to vector<1x128xf32>
    %cst_14 = arith.constant 3.200000e+01 : f32
    %20 = vector.broadcast %cst_14 : f32 to vector<1x128xf32>
    %21 = arith.divf %19, %20 : vector<1x128xf32>
    %22 = vector.broadcast %21 : vector<1x128xf32> to vector<32x128xf32>
    %23 = arith.subf %15, %22 : vector<32x128xf32>
    %24 = vector.broadcast %21 : vector<1x128xf32> to vector<32x128xf32>
    %25 = arith.subf %15, %24 : vector<32x128xf32>
    %26 = arith.mulf %23, %25 : vector<32x128xf32>
    %cst_15 = arith.constant dense<0.000000e+00> : vector<128xf32>
    %27 = vector.multi_reduction <add>, %26, %cst_15 [0] : vector<32x128xf32> to vector<128xf32>
    %28 = vector.shape_cast %27 : vector<128xf32> to vector<1x128xf32>
    %cst_16 = arith.constant 3.200000e+01 : f32
    %29 = vector.broadcast %cst_16 : f32 to vector<1x128xf32>
    %30 = arith.divf %28, %29 : vector<1x128xf32>
    %31 = vector.broadcast %21 : vector<1x128xf32> to vector<32x128xf32>
    %32 = arith.subf %15, %31 : vector<32x128xf32>
    %33 = vector.broadcast %16 : vector<1x128xf32> to vector<32x128xf32>
    %34 = arith.mulf %33, %32 : vector<32x128xf32>
    %cst_17 = arith.constant 9.99999974E-6 : f32
    %35 = vector.broadcast %cst_17 : f32 to vector<1x128xf32>
    %36 = arith.addf %30, %35 : vector<1x128xf32>
    %37 = math.rsqrt %36 : vector<1x128xf32>
    %38 = vector.broadcast %37 : vector<1x128xf32> to vector<32x128xf32>
    %39 = arith.mulf %34, %38 : vector<32x128xf32>
    %40 = vector.broadcast %17 : vector<1x128xf32> to vector<32x128xf32>
    %41 = arith.addf %39, %40 : vector<32x128xf32>
    %42 = arith.truncf %41 : vector<32x128xf32> to vector<32x128xbf16>
    %cst_18 = arith.constant dense<0.000000e+00> : vector<96x128xf32>
    %43 = tpu.matmul %0, %42, %cst_18 {dimension_numbers = #tpu.dot_dimension_numbers<[1], [0], [0], [1], [0, 0, 1, 1], [], []>} : vector<96x32xbf16>, vector<32x128xbf16>, vector<96x128xf32> -> vector<96x128xf32>
    %44 = vector.extract_strided_slice %43 {offsets = [0, 0], sizes = [32, 128], strides = [1, 1]} : vector<96x128xf32> to vector<32x128xf32>
    %45 = vector.extract_strided_slice %43 {offsets = [32, 0], sizes = [32, 128], strides = [1, 1]} : vector<96x128xf32> to vector<32x128xf32>
    %46 = vector.extract_strided_slice %43 {offsets = [64, 0], sizes = [32, 128], strides = [1, 1]} : vector<96x128xf32> to vector<32x128xf32>
    %47 = tpu.concatenate %44, %45, %46 in 1 : vector<32x128xf32>, vector<32x128xf32>, vector<32x128xf32> -> vector<32x384xf32>
    %c0_19 = arith.constant 0 : index
    %c0_20 = arith.constant 0 : index
    %48 = vector.load %arg7[%c0_19, %c0_20] : memref<384x128xbf16, #tpu.memory_space<vmem>>, vector<384x128xbf16>
    %49 = arith.truncf %47 : vector<32x384xf32> to vector<32x384xbf16>
    %cst_21 = arith.constant dense<0.000000e+00> : vector<32x128xf32>
    %50 = tpu.matmul %49, %48, %cst_21 {dimension_numbers = #tpu.dot_dimension_numbers<[1], [0], [0], [1], [0, 0, 1, 1], [], []>} : vector<32x384xbf16>, vector<384x128xbf16>, vector<32x128xf32> -> vector<32x128xf32>
    %c0_22 = arith.constant 0 : index
    %c0_23 = arith.constant 0 : index
    %51 = vector.load %arg8[%c0_22, %c0_23] : memref<1x128xf32, #tpu.memory_space<vmem>>, vector<1x128xf32>
    %52 = vector.broadcast %51 : vector<1x128xf32> to vector<32x128xf32>
    %53 = arith.addf %50, %52 : vector<32x128xf32>
    %cst_24 = arith.constant 0.000000e+00 : f32
    %54 = vector.broadcast %cst_24 : f32 to vector<32x128xf32>
    %55 = arith.maximumf %53, %54 : vector<32x128xf32>
    %c0_25 = arith.constant 0 : index
    %c0_26 = arith.constant 0 : index
    %56 = vector.load %arg9[%c0_25, %c0_26] : memref<1x128xf32, #tpu.memory_space<vmem>>, vector<1x128xf32>
    %c0_27 = arith.constant 0 : index
    %c0_28 = arith.constant 0 : index
    %57 = vector.load %arg10[%c0_27, %c0_28] : memref<1x128xf32, #tpu.memory_space<vmem>>, vector<1x128xf32>
    %cst_29 = arith.constant dense<0.000000e+00> : vector<128xf32>
    %58 = vector.multi_reduction <add>, %55, %cst_29 [0] : vector<32x128xf32> to vector<128xf32>
    %59 = vector.shape_cast %58 : vector<128xf32> to vector<1x128xf32>
    %cst_30 = arith.constant 3.200000e+01 : f32
    %60 = vector.broadcast %cst_30 : f32 to vector<1x128xf32>
    %61 = arith.divf %59, %60 : vector<1x128xf32>
    %62 = vector.broadcast %61 : vector<1x128xf32> to vector<32x128xf32>
    %63 = arith.subf %55, %62 : vector<32x128xf32>
    %64 = vector.broadcast %61 : vector<1x128xf32> to vector<32x128xf32>
    %65 = arith.subf %55, %64 : vector<32x128xf32>
    %66 = arith.mulf %63, %65 : vector<32x128xf32>
    %cst_31 = arith.constant dense<0.000000e+00> : vector<128xf32>
    %67 = vector.multi_reduction <add>, %66, %cst_31 [0] : vector<32x128xf32> to vector<128xf32>
    %68 = vector.shape_cast %67 : vector<128xf32> to vector<1x128xf32>
    %cst_32 = arith.constant 3.200000e+01 : f32
    %69 = vector.broadcast %cst_32 : f32 to vector<1x128xf32>
    %70 = arith.divf %68, %69 : vector<1x128xf32>
    %71 = vector.broadcast %61 : vector<1x128xf32> to vector<32x128xf32>
    %72 = arith.subf %55, %71 : vector<32x128xf32>
    %73 = vector.broadcast %56 : vector<1x128xf32> to vector<32x128xf32>
    %74 = arith.mulf %73, %72 : vector<32x128xf32>
    %cst_33 = arith.constant 9.99999974E-6 : f32
    %75 = vector.broadcast %cst_33 : f32 to vector<1x128xf32>
    %76 = arith.addf %70, %75 : vector<1x128xf32>
    %77 = math.rsqrt %76 : vector<1x128xf32>
    %78 = vector.broadcast %77 : vector<1x128xf32> to vector<32x128xf32>
    %79 = arith.mulf %74, %78 : vector<32x128xf32>
    %80 = vector.broadcast %57 : vector<1x128xf32> to vector<32x128xf32>
    %81 = arith.addf %79, %80 : vector<32x128xf32>
    %c0_34 = arith.constant 0 : index
    %c0_35 = arith.constant 0 : index
    %82 = vector.load %arg19[%c0_34, %c0_35] : memref<32x128xf32, #tpu.memory_space<vmem>>, vector<32x128xf32>
    tpu.vector_store %arg19[%c0_34, %c0_35], %81 {strides = array<i32>} : memref<32x128xf32, #tpu.memory_space<vmem>>, vector<32x128xf32>,
    %83 = arith.mulf %81, %81 : vector<32x128xf32>
    %cst_36 = arith.constant dense<0.000000e+00> : vector<32xf32>
    %84 = vector.multi_reduction <add>, %83, %cst_36 [1] : vector<32x128xf32> to vector<32xf32>
    %85 = vector.shape_cast %84 : vector<32xf32> to vector<32x1xf32>
    %cst_37 = arith.constant 1.000000e-24 : f32
    %86 = vector.broadcast %cst_37 : f32 to vector<32x1xf32>
    %87 = arith.maximumf %85, %86 : vector<32x1xf32>
    %88 = math.rsqrt %87 : vector<32x1xf32>
    %89 = vector.broadcast %88 : vector<32x1xf32> to vector<32x128xf32>
    %90 = arith.mulf %81, %89 : vector<32x128xf32>
    %c0_38 = arith.constant 0 : index
    %c0_39 = arith.constant 0 : index
    %91 = vector.load %arg12[%c0_38, %c0_39] : memref<128x64xf32, #tpu.memory_space<vmem>>, vector<128x64xf32>
    %cst_40 = arith.constant dense<0.000000e+00> : vector<32x64xf32>
    %92 = tpu.matmul %90, %91, %cst_40 {dimension_numbers = #tpu.dot_dimension_numbers<[1], [0], [0], [1], [0, 0, 1, 1], [], []>} : vector<32x128xf32>, vector<128x64xf32>, vector<32x64xf32> -> vector<32x64xf32>
    %93 = tpu.iota {dimensions = array<i32: 1>} : vector<32x64xi32>
    %cst_41 = arith.constant dense<0xFF800000> : vector<32xf32>
    %94 = vector.multi_reduction <maximumf>, %92, %cst_41 [1] : vector<32x64xf32> to vector<32xf32>
    %95 = vector.shape_cast %94 : vector<32xf32> to vector<32x1xf32>
    %96 = vector.broadcast %95 : vector<32x1xf32> to vector<32x64xf32>
    %97 = arith.cmpf oge, %92, %96 : vector<32x64xf32>
    %98 = arith.sitofp %93 : vector<32x64xi32> to vector<32x64xf32>
    %cst_42 = arith.constant 6.400000e+01 : f32
    %99 = vector.broadcast %cst_42 : f32 to vector<32x64xf32>
    %100 = arith.select %97, %98, %99 : vector<32x64xi1>, vector<32x64xf32>
    %cst_43 = arith.constant dense<0x7F800000> : vector<32xf32>
    %101 = vector.multi_reduction <minimumf>, %100, %cst_43 [1] : vector<32x64xf32> to vector<32xf32>
    %102 = vector.shape_cast %101 : vector<32xf32> to vector<32x1xf32>
    %103 = arith.fptosi %102 : vector<32x1xf32> to vector<32x1xi32>
    %104 = vector.broadcast %103 : vector<32x1xi32> to vector<32x64xi32>
    %105 = arith.cmpi eq, %93, %104 : vector<32x64xi32>
    %106 = arith.extui %105 : vector<32x64xi1> to vector<32x64xi32>
    %107 = arith.sitofp %106 : vector<32x64xi32> to vector<32x64xf32>
    %c0_44 = arith.constant 0 : index
    %c0_45 = arith.constant 0 : index
    %108 = vector.load %arg11[%c0_44, %c0_45] : memref<64x128xf32, #tpu.memory_space<vmem>>, vector<64x128xf32>
    %cst_46 = arith.constant dense<0.000000e+00> : vector<32x128xf32>
    %109 = tpu.matmul %107, %108, %cst_46 {dimension_numbers = #tpu.dot_dimension_numbers<[1], [0], [0], [1], [0, 0, 1, 1], [], []>} : vector<32x64xf32>, vector<64x128xf32>, vector<32x128xf32> -> vector<32x128xf32>
    %c0_47 = arith.constant 0 : index
    %c0_48 = arith.constant 0 : index
    %110 = vector.load %arg2[%c0_47, %c0_48] : memref<1x64xf32, #tpu.memory_space<vmem>>, vector<1x64xf32>
    %111 = vector.broadcast %110 : vector<1x64xf32> to vector<32x64xf32>
    %112 = arith.mulf %107, %111 : vector<32x64xf32>
    %cst_49 = arith.constant dense<0.000000e+00> : vector<32xf32>
    %113 = vector.multi_reduction <add>, %112, %cst_49 [1] : vector<32x64xf32> to vector<32xf32>
    %114 = vector.shape_cast %113 : vector<32xf32> to vector<32x1xf32>
    %cst_50 = arith.constant 1.000000e+00 : f32
    %115 = vector.broadcast %cst_50 : f32 to vector<32x1xf32>
    %116 = arith.subf %115, %114 : vector<32x1xf32>
    %117 = vector.broadcast %116 : vector<32x1xf32> to vector<32x128xf32>
    %118 = arith.mulf %109, %117 : vector<32x128xf32>
    %119 = arith.subf %109, %90 : vector<32x128xf32>
    %120 = arith.mulf %119, %119 : vector<32x128xf32>
    %cst_51 = arith.constant dense<0.000000e+00> : vector<32xf32>
    %121 = vector.multi_reduction <add>, %120, %cst_51 [1] : vector<32x128xf32> to vector<32xf32>
    %122 = vector.shape_cast %121 : vector<32xf32> to vector<32x1xf32>
    %cst_52 = arith.constant dense<0.000000e+00> : vector<1xf32>
    %123 = vector.multi_reduction <add>, %122, %cst_52 [0] : vector<32x1xf32> to vector<1xf32>
    %124 = vector.shape_cast %123 : vector<1xf32> to vector<1x1xf32>
    %cst_53 = arith.constant 1.250000e+00 : f32
    %125 = vector.broadcast %cst_53 : f32 to vector<1x1xf32>
    %126 = arith.mulf %125, %124 : vector<1x1xf32>
    %cst_54 = arith.constant 1.024000e+03 : f32
    %127 = vector.broadcast %cst_54 : f32 to vector<1x1xf32>
    %128 = arith.divf %126, %127 : vector<1x1xf32>
    %c0_55 = arith.constant 0 : index
    %c0_56 = arith.constant 0 : index
    %129 = vector.load %arg20[%c0_55, %c0_56] : memref<32x128xf32, #tpu.memory_space<vmem>>, vector<32x128xf32>
    tpu.vector_store %arg20[%c0_55, %c0_56], %118 {strides = array<i32>} : memref<32x128xf32, #tpu.memory_space<vmem>>, vector<32x128xf32>,
    %130 = tpu.concatenate %109, %118 in 1 : vector<32x128xf32>, vector<32x128xf32> -> vector<32x256xf32>
    %c0_57 = arith.constant 0 : index
    %c0_58 = arith.constant 0 : index
    %131 = vector.load %arg13[%c0_57, %c0_58] : memref<384x128xbf16, #tpu.memory_space<vmem>>, vector<384x128xbf16>
    %c0_59 = arith.constant 0 : index
    %c0_60 = arith.constant 0 : index
    %132 = vector.load %arg14[%c0_59, %c0_60] : memref<1x128xf32, #tpu.memory_space<vmem>>, vector<1x128xf32>
    %133 = arith.truncf %130 : vector<32x256xf32> to vector<32x256xbf16>
    %cst_61 = arith.constant dense<0.000000e+00> : vector<96x256xf32>
    %134 = tpu.matmul %0, %133, %cst_61 {dimension_numbers = #tpu.dot_dimension_numbers<[1], [0], [0], [1], [0, 0, 1, 1], [], []>} : vector<96x32xbf16>, vector<32x256xbf16>, vector<96x256xf32> -> vector<96x256xf32>
    %135 = vector.extract_strided_slice %134 {offsets = [0, 0], sizes = [32, 128], strides = [1, 1]} : vector<96x256xf32> to vector<32x128xf32>
    %136 = vector.extract_strided_slice %134 {offsets = [32, 0], sizes = [32, 128], strides = [1, 1]} : vector<96x256xf32> to vector<32x128xf32>
    %137 = vector.extract_strided_slice %134 {offsets = [64, 0], sizes = [32, 128], strides = [1, 1]} : vector<96x256xf32> to vector<32x128xf32>
    %138 = tpu.concatenate %135, %136, %137 in 1 : vector<32x128xf32>, vector<32x128xf32>, vector<32x128xf32> -> vector<32x384xf32>
    %139 = arith.truncf %138 : vector<32x384xf32> to vector<32x384xbf16>
    %cst_62 = arith.constant dense<0.000000e+00> : vector<32x128xf32>
    %140 = tpu.matmul %139, %131, %cst_62 {dimension_numbers = #tpu.dot_dimension_numbers<[1], [0], [0], [1], [0, 0, 1, 1], [], []>} : vector<32x384xbf16>, vector<384x128xbf16>, vector<32x128xf32> -> vector<32x128xf32>
    %141 = vector.broadcast %132 : vector<1x128xf32> to vector<32x128xf32>
    %142 = arith.addf %140, %141 : vector<32x128xf32>
    %143 = vector.extract_strided_slice %134 {offsets = [0, 128], sizes = [32, 128], strides = [1, 1]} : vector<96x256xf32> to vector<32x128xf32>
    %144 = vector.extract_strided_slice %134 {offsets = [32, 128], sizes = [32, 128], strides = [1, 1]} : vector<96x256xf32> to vector<32x128xf32>
    %145 = vector.extract_strided_slice %134 {offsets = [64, 128], sizes = [32, 128], strides = [1, 1]} : vector<96x256xf32> to vector<32x128xf32>
    %146 = tpu.concatenate %143, %144, %145 in 1 : vector<32x128xf32>, vector<32x128xf32>, vector<32x128xf32> -> vector<32x384xf32>
    %147 = arith.truncf %146 : vector<32x384xf32> to vector<32x384xbf16>
    %cst_63 = arith.constant dense<0.000000e+00> : vector<32x128xf32>
    %148 = tpu.matmul %147, %131, %cst_63 {dimension_numbers = #tpu.dot_dimension_numbers<[1], [0], [0], [1], [0, 0, 1, 1], [], []>} : vector<32x384xbf16>, vector<384x128xbf16>, vector<32x128xf32> -> vector<32x128xf32>
    %149 = vector.broadcast %132 : vector<1x128xf32> to vector<32x128xf32>
    %150 = arith.addf %148, %149 : vector<32x128xf32>
    %c0_64 = arith.constant 0 : index
    %c0_65 = arith.constant 0 : index
    %151 = vector.load %arg17[%c0_64, %c0_65] : memref<1x128xf32, #tpu.memory_space<vmem>>, vector<1x128xf32>
    %c0_66 = arith.constant 0 : index
    %c0_67 = arith.constant 0 : index
    %152 = vector.load %arg18[%c0_66, %c0_67] : memref<1x128xf32, #tpu.memory_space<vmem>>, vector<1x128xf32>
    %cst_68 = arith.constant 0.000000e+00 : f32
    %153 = vector.broadcast %cst_68 : f32 to vector<32x128xf32>
    %154 = arith.maximumf %142, %153 : vector<32x128xf32>
    %cst_69 = arith.constant dense<0.000000e+00> : vector<128xf32>
    %155 = vector.multi_reduction <add>, %154, %cst_69 [0] : vector<32x128xf32> to vector<128xf32>
    %156 = vector.shape_cast %155 : vector<128xf32> to vector<1x128xf32>
    %cst_70 = arith.constant 3.200000e+01 : f32
    %157 = vector.broadcast %cst_70 : f32 to vector<1x128xf32>
    %158 = arith.divf %156, %157 : vector<1x128xf32>
    %159 = vector.broadcast %158 : vector<1x128xf32> to vector<32x128xf32>
    %160 = arith.subf %154, %159 : vector<32x128xf32>
    %161 = vector.broadcast %158 : vector<1x128xf32> to vector<32x128xf32>
    %162 = arith.subf %154, %161 : vector<32x128xf32>
    %163 = arith.mulf %160, %162 : vector<32x128xf32>
    %cst_71 = arith.constant dense<0.000000e+00> : vector<128xf32>
    %164 = vector.multi_reduction <add>, %163, %cst_71 [0] : vector<32x128xf32> to vector<128xf32>
    %165 = vector.shape_cast %164 : vector<128xf32> to vector<1x128xf32>
    %cst_72 = arith.constant 3.200000e+01 : f32
    %166 = vector.broadcast %cst_72 : f32 to vector<1x128xf32>
    %167 = arith.divf %165, %166 : vector<1x128xf32>
    %168 = vector.broadcast %158 : vector<1x128xf32> to vector<32x128xf32>
    %169 = arith.subf %154, %168 : vector<32x128xf32>
    %170 = vector.broadcast %151 : vector<1x128xf32> to vector<32x128xf32>
    %171 = arith.mulf %170, %169 : vector<32x128xf32>
    %cst_73 = arith.constant 9.99999974E-6 : f32
    %172 = vector.broadcast %cst_73 : f32 to vector<1x128xf32>
    %173 = arith.addf %167, %172 : vector<1x128xf32>
    %174 = math.rsqrt %173 : vector<1x128xf32>
    %175 = vector.broadcast %174 : vector<1x128xf32> to vector<32x128xf32>
    %176 = arith.mulf %171, %175 : vector<32x128xf32>
    %177 = vector.broadcast %152 : vector<1x128xf32> to vector<32x128xf32>
    %178 = arith.addf %176, %177 : vector<32x128xf32>
    %cst_74 = arith.constant 0.000000e+00 : f32
    %179 = vector.broadcast %cst_74 : f32 to vector<32x128xf32>
    %180 = arith.maximumf %150, %179 : vector<32x128xf32>
    %cst_75 = arith.constant dense<0.000000e+00> : vector<128xf32>
    %181 = vector.multi_reduction <add>, %180, %cst_75 [0] : vector<32x128xf32> to vector<128xf32>
    %182 = vector.shape_cast %181 : vector<128xf32> to vector<1x128xf32>
    %cst_76 = arith.constant 3.200000e+01 : f32
    %183 = vector.broadcast %cst_76 : f32 to vector<1x128xf32>
    %184 = arith.divf %182, %183 : vector<1x128xf32>
    %185 = vector.broadcast %184 : vector<1x128xf32> to vector<32x128xf32>
    %186 = arith.subf %180, %185 : vector<32x128xf32>
    %187 = vector.broadcast %184 : vector<1x128xf32> to vector<32x128xf32>
    %188 = arith.subf %180, %187 : vector<32x128xf32>
    %189 = arith.mulf %186, %188 : vector<32x128xf32>
    %cst_77 = arith.constant dense<0.000000e+00> : vector<128xf32>
    %190 = vector.multi_reduction <add>, %189, %cst_77 [0] : vector<32x128xf32> to vector<128xf32>
    %191 = vector.shape_cast %190 : vector<128xf32> to vector<1x128xf32>
    %cst_78 = arith.constant 3.200000e+01 : f32
    %192 = vector.broadcast %cst_78 : f32 to vector<1x128xf32>
    %193 = arith.divf %191, %192 : vector<1x128xf32>
    %194 = vector.broadcast %184 : vector<1x128xf32> to vector<32x128xf32>
    %195 = arith.subf %180, %194 : vector<32x128xf32>
    %196 = vector.broadcast %151 : vector<1x128xf32> to vector<32x128xf32>
    %197 = arith.mulf %196, %195 : vector<32x128xf32>
    %cst_79 = arith.constant 9.99999974E-6 : f32
    %198 = vector.broadcast %cst_79 : f32 to vector<1x128xf32>
    %199 = arith.addf %193, %198 : vector<1x128xf32>
    %200 = math.rsqrt %199 : vector<1x128xf32>
    %201 = vector.broadcast %200 : vector<1x128xf32> to vector<32x128xf32>
    %202 = arith.mulf %197, %201 : vector<32x128xf32>
    %203 = vector.broadcast %152 : vector<1x128xf32> to vector<32x128xf32>
    %204 = arith.addf %202, %203 : vector<32x128xf32>
    %205 = tpu.concatenate %178, %204 in 1 : vector<32x128xf32>, vector<32x128xf32> -> vector<32x256xf32>
    %c0_80 = arith.constant 0 : index
    %c0_81 = arith.constant 0 : index
    %206 = vector.load %arg15[%c0_80, %c0_81] : memref<384x128xbf16, #tpu.memory_space<vmem>>, vector<384x128xbf16>
    %c0_82 = arith.constant 0 : index
    %c0_83 = arith.constant 0 : index
    %207 = vector.load %arg16[%c0_82, %c0_83] : memref<1x128xf32, #tpu.memory_space<vmem>>, vector<1x128xf32>
    %208 = arith.truncf %205 : vector<32x256xf32> to vector<32x256xbf16>
    %cst_84 = arith.constant dense<0.000000e+00> : vector<96x256xf32>
    %209 = tpu.matmul %0, %208, %cst_84 {dimension_numbers = #tpu.dot_dimension_numbers<[1], [0], [0], [1], [0, 0, 1, 1], [], []>} : vector<96x32xbf16>, vector<32x256xbf16>, vector<96x256xf32> -> vector<96x256xf32>
    %210 = vector.extract_strided_slice %209 {offsets = [0, 0], sizes = [32, 128], strides = [1, 1]} : vector<96x256xf32> to vector<32x128xf32>
    %211 = vector.extract_strided_slice %209 {offsets = [32, 0], sizes = [32, 128], strides = [1, 1]} : vector<96x256xf32> to vector<32x128xf32>
    %212 = vector.extract_strided_slice %209 {offsets = [64, 0], sizes = [32, 128], strides = [1, 1]} : vector<96x256xf32> to vector<32x128xf32>
    %213 = tpu.concatenate %210, %211, %212 in 1 : vector<32x128xf32>, vector<32x128xf32>, vector<32x128xf32> -> vector<32x384xf32>
    %214 = arith.truncf %213 : vector<32x384xf32> to vector<32x384xbf16>
    %cst_85 = arith.constant dense<0.000000e+00> : vector<32x128xf32>
    %215 = tpu.matmul %214, %206, %cst_85 {dimension_numbers = #tpu.dot_dimension_numbers<[1], [0], [0], [1], [0, 0, 1, 1], [], []>} : vector<32x384xbf16>, vector<384x128xbf16>, vector<32x128xf32> -> vector<32x128xf32>
    %216 = vector.broadcast %207 : vector<1x128xf32> to vector<32x128xf32>
    %217 = arith.addf %215, %216 : vector<32x128xf32>
    %218 = vector.extract_strided_slice %209 {offsets = [0, 128], sizes = [32, 128], strides = [1, 1]} : vector<96x256xf32> to vector<32x128xf32>
    %219 = vector.extract_strided_slice %209 {offsets = [32, 128], sizes = [32, 128], strides = [1, 1]} : vector<96x256xf32> to vector<32x128xf32>
    %220 = vector.extract_strided_slice %209 {offsets = [64, 128], sizes = [32, 128], strides = [1, 1]} : vector<96x256xf32> to vector<32x128xf32>
    %221 = tpu.concatenate %218, %219, %220 in 1 : vector<32x128xf32>, vector<32x128xf32>, vector<32x128xf32> -> vector<32x384xf32>
    %222 = arith.truncf %221 : vector<32x384xf32> to vector<32x384xbf16>
    %cst_86 = arith.constant dense<0.000000e+00> : vector<32x128xf32>
    %223 = tpu.matmul %222, %206, %cst_86 {dimension_numbers = #tpu.dot_dimension_numbers<[1], [0], [0], [1], [0, 0, 1, 1], [], []>} : vector<32x384xbf16>, vector<384x128xbf16>, vector<32x128xf32> -> vector<32x128xf32>
    %224 = vector.broadcast %207 : vector<1x128xf32> to vector<32x128xf32>
    %225 = arith.addf %223, %224 : vector<32x128xf32>
    %c0_87 = arith.constant 0 : index
    %c0_88 = arith.constant 0 : index
    %226 = vector.load %arg0[%c0_87, %c0_88] : memref<32x128xf32, #tpu.memory_space<vmem>>, vector<32x128xf32>
    %227 = arith.subf %217, %226 : vector<32x128xf32>
    %228 = arith.mulf %227, %227 : vector<32x128xf32>
    %cst_89 = arith.constant dense<0.000000e+00> : vector<32xf32>
    %229 = vector.multi_reduction <add>, %228, %cst_89 [1] : vector<32x128xf32> to vector<32xf32>
    %230 = vector.shape_cast %229 : vector<32xf32> to vector<32x1xf32>
    %cst_90 = arith.constant dense<0.000000e+00> : vector<1xf32>
    %231 = vector.multi_reduction <add>, %230, %cst_90 [0] : vector<32x1xf32> to vector<1xf32>
    %232 = vector.shape_cast %231 : vector<1xf32> to vector<1x1xf32>
    %cst_91 = arith.constant 5.120000e+02 : f32
    %233 = vector.broadcast %cst_91 : f32 to vector<1x1xf32>
    %234 = arith.divf %232, %233 : vector<1x1xf32>
    %235 = arith.mulf %225, %225 : vector<32x128xf32>
    %cst_92 = arith.constant dense<0.000000e+00> : vector<32xf32>
    %236 = vector.multi_reduction <add>, %235, %cst_92 [1] : vector<32x128xf32> to vector<32xf32>
    %237 = vector.shape_cast %236 : vector<32xf32> to vector<32x1xf32>
    %cst_93 = arith.constant 1.000000e-24 : f32
    %238 = vector.broadcast %cst_93 : f32 to vector<32x1xf32>
    %239 = arith.maximumf %237, %238 : vector<32x1xf32>
    %240 = math.rsqrt %239 : vector<32x1xf32>
    %241 = vector.broadcast %240 : vector<32x1xf32> to vector<32x128xf32>
    %242 = arith.mulf %225, %241 : vector<32x128xf32>
    %243 = arith.mulf %226, %226 : vector<32x128xf32>
    %cst_94 = arith.constant dense<0.000000e+00> : vector<32xf32>
    %244 = vector.multi_reduction <add>, %243, %cst_94 [1] : vector<32x128xf32> to vector<32xf32>
    %245 = vector.shape_cast %244 : vector<32xf32> to vector<32x1xf32>
    %cst_95 = arith.constant 1.000000e-24 : f32
    %246 = vector.broadcast %cst_95 : f32 to vector<32x1xf32>
    %247 = arith.maximumf %245, %246 : vector<32x1xf32>
    %248 = math.rsqrt %247 : vector<32x1xf32>
    %249 = vector.broadcast %248 : vector<32x1xf32> to vector<32x128xf32>
    %250 = arith.mulf %226, %249 : vector<32x128xf32>
    %251 = arith.mulf %242, %250 : vector<32x128xf32>
    %cst_96 = arith.constant dense<0.000000e+00> : vector<32xf32>
    %252 = vector.multi_reduction <add>, %251, %cst_96 [1] : vector<32x128xf32> to vector<32xf32>
    %253 = vector.shape_cast %252 : vector<32xf32> to vector<32x1xf32>
    %cst_97 = arith.constant 1.000000e+00 : f32
    %254 = vector.broadcast %cst_97 : f32 to vector<32x1xf32>
    %255 = arith.subf %254, %253 : vector<32x1xf32>
    %256 = arith.mulf %255, %255 : vector<32x1xf32>
    %257 = arith.mulf %256, %114 : vector<32x1xf32>
    %cst_98 = arith.constant dense<0.000000e+00> : vector<32xf32>
    %258 = vector.multi_reduction <add>, %257, %cst_98 [1] : vector<32x1xf32> to vector<32xf32>
    %259 = vector.shape_cast %258 : vector<32xf32> to vector<32x1xf32>
    %cst_99 = arith.constant dense<0.000000e+00> : vector<1xf32>
    %260 = vector.multi_reduction <add>, %259, %cst_99 [0] : vector<32x1xf32> to vector<1xf32>
    %261 = vector.shape_cast %260 : vector<1xf32> to vector<1x1xf32>
    %cst_100 = arith.constant dense<0.000000e+00> : vector<32xf32>
    %262 = vector.multi_reduction <add>, %114, %cst_100 [1] : vector<32x1xf32> to vector<32xf32>
    %263 = vector.shape_cast %262 : vector<32xf32> to vector<32x1xf32>
    %cst_101 = arith.constant dense<0.000000e+00> : vector<1xf32>
    %264 = vector.multi_reduction <add>, %263, %cst_101 [0] : vector<32x1xf32> to vector<1xf32>
    %265 = vector.shape_cast %264 : vector<1xf32> to vector<1x1xf32>
    %cst_102 = arith.constant 9.99999996E-13 : f32
    %266 = vector.broadcast %cst_102 : f32 to vector<1x1xf32>
    %267 = arith.addf %265, %266 : vector<1x1xf32>
    %268 = arith.divf %261, %267 : vector<1x1xf32>
    %269 = tpu.iota {dimensions = array<i32: 1>} : vector<1x128xi32>
    %c0_i32 = arith.constant 0 : i32
    %270 = vector.broadcast %c0_i32 : i32 to vector<1x128xi32>
    %271 = arith.cmpi eq, %269, %270 : vector<1x128xi32>
    %cst_103 = arith.constant 0.000000e+00 : f32
    %272 = vector.shape_cast %128 : vector<1x1xf32> to vector<1x1xf32>
    %273 = vector.broadcast %272 : vector<1x1xf32> to vector<1x128xf32>
    %274 = vector.broadcast %cst_103 : f32 to vector<1x128xf32>
    %275 = arith.select %271, %273, %274 : vector<1x128xi1>, vector<1x128xf32>
    %c1_i32 = arith.constant 1 : i32
    %276 = vector.broadcast %c1_i32 : i32 to vector<1x128xi32>
    %277 = arith.cmpi eq, %269, %276 : vector<1x128xi32>
    %cst_104 = arith.constant 0.000000e+00 : f32
    %278 = vector.shape_cast %234 : vector<1x1xf32> to vector<1x1xf32>
    %279 = vector.broadcast %278 : vector<1x1xf32> to vector<1x128xf32>
    %280 = vector.broadcast %cst_104 : f32 to vector<1x128xf32>
    %281 = arith.select %277, %279, %280 : vector<1x128xi1>, vector<1x128xf32>
    %282 = arith.addf %275, %281 : vector<1x128xf32>
    %c2_i32 = arith.constant 2 : i32
    %283 = vector.broadcast %c2_i32 : i32 to vector<1x128xi32>
    %284 = arith.cmpi eq, %269, %283 : vector<1x128xi32>
    %cst_105 = arith.constant 0.000000e+00 : f32
    %285 = vector.shape_cast %268 : vector<1x1xf32> to vector<1x1xf32>
    %286 = vector.broadcast %285 : vector<1x1xf32> to vector<1x128xf32>
    %287 = vector.broadcast %cst_105 : f32 to vector<1x128xf32>
    %288 = arith.select %284, %286, %287 : vector<1x128xi1>, vector<1x128xf32>
    %289 = arith.addf %282, %288 : vector<1x128xf32>
    %c0_106 = arith.constant 0 : index
    %c0_107 = arith.constant 0 : index
    %290 = vector.load %arg21[%c0_106, %c0_107] : memref<1x128xf32, #tpu.memory_space<vmem>>, vector<1x128xf32>
    tpu.vector_store %arg21[%c0_106, %c0_107], %289 {strides = array<i32>} : memref<1x128xf32, #tpu.memory_space<vmem>>, vector<1x128xf32>,
    return
  }
}

</mosaic_0001>

<bundles_post_ra>
// kernel: _lambda_.1
= control target key start
LH: loop header
LB: loop body
LE: loop exit
PB: predicated region body
PF: predicated region fallthrough
CT: control target
= control target key end

     0   :  { %s3887_s0 = inlined_call_operand.vmem [shape: f32[32,128], index: 0, kind: input, shape index: {}]   ;;  %s3888_s1 = inlined_call_operand.vmem [shape: bf16[96,32], index: 1, kind: input, shape index: {}]   ;;  %s3889_s2 = inlined_call_operand.vmem [shape: f32[1,64], index: 2, kind: input, shape index: {}]   ;;  %s3890_s3 = inlined_call_operand.vmem [shape: bf16[384,128], index: 3, kind: input, shape index: {}]   ;;  %s3891_s4 = inlined_call_operand.vmem [shape: f32[1,128], index: 4, kind: input, shape index: {}]   ;;  %s3892_s5 = inlined_call_operand.vmem [shape: f32[1,128], index: 5, kind: input, shape index: {}]   ;;  %s3893_s6 = inlined_call_operand.vmem [shape: f32[1,128], index: 6, kind: input, shape index: {}]   ;;  %s3894_s7 = inlined_call_operand.hbm [shape: bf16[384,128], index: 7, kind: input, shape index: {}]   ;;  %s3895_s8 = inlined_call_operand.vmem [shape: f32[1,128], index: 8, kind: input, shape index: {}]   ;;  %s3896_s9 = inlined_call_operand.vmem [shape: f32[1,128], index: 9, kind: input, shape index: {}]   ;;  %s3897_s10 = inlined_call_operand.vmem [shape: f32[1,128], index: 10, kind: input, shape index: {}]   ;;  %s3898_s11 = inlined_call_operand.vmem [shape: f32[64,128], index: 11, kind: input, shape index: {}]   ;;  %s3899_s12 = inlined_call_operand.vmem [shape: f32[128,64], index: 12, kind: input, shape index: {}]   ;;  %s3900_s13 = inlined_call_operand.hbm [shape: bf16[384,128], index: 13, kind: input, shape index: {}]   ;;  %s3901_s14 = inlined_call_operand.vmem [shape: f32[1,128], index: 14, kind: input, shape index: {}]   ;;  %s3902_s15 = inlined_call_operand.hbm [shape: bf16[384,128], index: 15, kind: input, shape index: {}]   ;;  %s3903_s16 = inlined_call_operand.vmem [shape: f32[1,128], index: 16, kind: input, shape index: {}]   ;;  %s3904_s17 = inlined_call_operand.vmem [shape: f32[1,128], index: 17, kind: input, shape index: {}]   ;;  %s3905_s18 = inlined_call_operand.vmem [shape: f32[1,128], index: 18, kind: input, shape index: {}]   ;;  %s3906_s19 = inlined_call_operand.hbm [shape: f32[32,128], index: 19, kind: output, shape index: {0}]   ;;  %s3907_s20 = inlined_call_operand.hbm [shape: f32[32,128], index: 20, kind: output, shape index: {1}]   ;;  %s3908_s21 = inlined_call_operand.vmem [shape: f32[1,128], index: 21, kind: output, shape index: {2}]  }
   0x1   :  { %3912 = sst [smem:[#allocation15_spill]] %s3887_s0 }
   0x2   :  { %3913 = sst [smem:[#allocation16_spill]] %s3888_s1 }
   0x3   :  { %3914 = sst [smem:[#allocation17_spill]] %s3889_s2 }
   0x4   :  { %3915 = sst [smem:[#allocation18_spill]] %s3890_s3 }
   0x5   :  { %3916 = sst [smem:[#allocation19_spill]] %s3891_s4 }
   0x6   :  { %3917 = sst [smem:[#allocation20_spill]] %s3892_s5 }
   0x7   :  { %27 = vsyncpa [#allocation3], 0 }
   0x8   :  { %28 = vsyncpa [#allocation6], 0 }
   0x9   :  { %29 = vsyncpa [#allocation4], 0 }
   0xa   :  { %30 = vsyncpa [#allocation10], 0  ;;  %s72_s26 = sshll.u32 %s3900_s13, 4  ;;  %s3171_s27 = smov [#allocation5]   ;;  %s73_s26 = int_to_ptr.hbm [resolvable:$true] %s72_s26 }
   0xb   :  { %s74_s3 = sshll.u32 %s3171_s27, 4  ;;  %s49_s0 = sshll.u32 %s3894_s7, 4  ;;  %s75_s3 = int_to_ptr.vmem [resolvable:$true] %s74_s3  ;;  %s50_s0 = int_to_ptr.hbm [resolvable:$true] %s49_s0 }
   0xc   :  { %s3172_s4 = smov 64   ;;  %s3173_s30 = smov 4  }
   0xd   :  { %80 = dma.hbm_to_vmem [thread:$0]  %s73_s26, 3072, %s75_s3, [#allocation6], %s3172_s4, %s3172_s4, %s3173_s30  }
   0xe   :  { %s3174_s5 = smov [#allocation2]   ;;  %s87_s24 = sshll.u32 %s3902_s15, 4  ;;  %s88_s24 = int_to_ptr.hbm [resolvable:$true] %s87_s24 }
   0xf   :  { %s51_s22 = sshll.u32 %s3174_s5, 4  ;;  %s3175_s13 = smov [#allocation7]   ;;  %s52_s22 = int_to_ptr.vmem [resolvable:$true] %s51_s22 }
  0x10   :  { %57 = dma.hbm_to_vmem [thread:$0]  %s50_s0, 3072, %s52_s22, [#allocation3], %s3172_s4, %s3172_s4, %s3173_s30  }
  0x11   :  { %s89_s2 = sshll.u32 %s3175_s13, 4  ;;  %s90_s2 = int_to_ptr.vmem [resolvable:$true] %s89_s2 }
  0x12   :  { %95 = dma.hbm_to_vmem [thread:$0]  %s88_s24, 3072, %s90_s2, [#allocation6], %s3172_s4, %s3172_s4, %s3173_s30  }
  0x13   :  { %3163 = dma.done.wait [#allocation3], 3072  }
  0x14   :  { %3164 = vsyncadd [#allocation3], 4294964224 }
  0x15   :  { %3165 = dma.done.wait [#allocation6], 6144  }
  0x16   :  { %3166 = vsyncadd [#allocation6], 4294961152  ;;  %s3918_s26 = sld [smem:[#allocation15_spill]]  ;;  %vm163_vm0 = vcmask 261120   ;;  %s3179_s7 = smov 128  }
  0x17   :  { %s3919_s5 = sld [smem:[#allocation16_spill]]  ;;  %s3180_s25 = smov 8  }
  0x18   :  { %s3920_s27 = sld [smem:[#allocation18_spill]]  ;;  %s3181_s3 = smov [#allocation9]  }
  0x19   :  { %s3921_s30 = sld [smem:[#allocation19_spill]]  ;;  %s2364_s15 = sshll.u32 %s3181_s3, 4  ;;  %s2365_s15 = int_to_ptr.vmem [resolvable:$true] %s2364_s15 }
  0x1a   :  { %s3922_s1 = sld [smem:[#allocation20_spill]]  ;;  %s2366_s0 = sshll.u32 %s3907_s20, 4  ;;  %s2367_s0 = int_to_ptr.hbm [resolvable:$true] %s2366_s0 }
  0x1c   :  { %v129_v0 = vld [vmem:[%s3918_s26 + $0x10] sm:$0xff]  ;;  %v130_v1 = vld [vmem:[%s3918_s26 + $0x18] sm:$0xff]  ;;  %v127_v2 = vld [vmem:[%s3918_s26] sm:$0xff] }
  0x1d   :  { %v132_v3 = vpack.c.bf16 %v130_v1, %v129_v0  ;;  %v128_v4 = vld [vmem:[%s3918_s26 + $0x8] sm:$0xff]  ;;  %v3318_v6 = vld [vmem:[%s3919_s5] sm:$0xff]  ;;  %v3332_v8 = vld [vmem:[%s3919_s5 + $0x10] sm:$0xff] }
  0x1e   :  { %v131_v5 = vpack.c.bf16 %v128_v4, %v127_v2  ;;  %v3325_v7 = vld [vmem:[%s3919_s5 + $0x8] sm:$0xff]  ;;  %v3339_v9 = vld [vmem:[%s3919_s5 + $0x18] sm:$0xff]  ;;  %v2853_v11 = vld [vmem:[%s3920_s27 + $0x30] sm:$0xff] }
  0x1f   :  { %188 = vmatpush.bf16.msra.mxu0 %v132_v3  ;;  %v2854_v10 = vld [vmem:[%s3920_s27 + $0x38] sm:$0xff]  ;;  %v2852_v12 = vld [vmem:[%s3920_s27 + $0x28] sm:$0xff]  ;;  %v2851_v13 = vld [vmem:[%s3920_s27 + $0x20] sm:$0xff]  ;;  %v3176_v3 = vmov 32.0  }
  0x20   :  { %423 = vmatpush.bf16.msra.mxu1 %v2854_v10  ;;  %v3358_v14 = vld [vmem:[%s3919_s5 + $0x20] sm:$0xff]  ;;  %v2850_v15 = vld [vmem:[%s3920_s27 + $0x18] sm:$0xff]  ;;  %v3368_v16 = vld [vmem:[%s3919_s5 + $0x28] sm:$0xff]  ;;  %2995 = vrcp.f32 %v3176_v3 }
  0x21   :  { %v2849_v17 = vld [vmem:[%s3920_s27 + $0x10] sm:$0xff]  ;;  %v2848_v18 = vld [vmem:[%s3920_s27 + $0x8] sm:$0xff]  ;;  %v2847_v19 = vld [vmem:[%s3920_s27] sm:$0xff] }
  0x22   :  { %v2862_v20 = vld [vmem:[%s3920_s27 + $0x78] sm:$0xff]  ;;  %v2861_v21 = vld [vmem:[%s3920_s27 + $0x70] sm:$0xff]  ;;  %v2860_v22 = vld [vmem:[%s3920_s27 + $0x68] sm:$0xff] }
  0x23   :  { %189 = vmatpush.bf16.msra.mxu0 %v131_v5  ;;  %442 = vmatpush.bf16.msra.mxu2 %v2862_v20  ;;  %v2859_v23 = vld [vmem:[%s3920_s27 + $0x60] sm:$0xff]  ;;  %v2858_v24 = vld [vmem:[%s3920_s27 + $0x58] sm:$0xff]  ;;  %v2857_v25 = vld [vmem:[%s3920_s27 + $0x50] sm:$0xff] }
  0x24   :  { %424 = vmatpush.bf16.msra.mxu1 %v2853_v11  ;;  %v2856_v27 = vld [vmem:[%s3920_s27 + $0x48] sm:$0xff]  ;;  %v2855_v28 = vld [vmem:[%s3920_s27 + $0x40] sm:$0xff]  ;;  %v2870_v31 = vld [vmem:[%s3920_s27 + $0xb8] sm:$0xff] }
  0x25   :  { %461 = vmatpush.bf16.msra.mxu3 %v2870_v31  ;;  %v2869_v32 = vld [vmem:[%s3920_s27 + $0xb0] sm:$0xff]  ;;  %v2868_v34 = vld [vmem:[%s3920_s27 + $0xa8] sm:$0xff]  ;;  %v2867_v35 = vld [vmem:[%s3920_s27 + $0xa0] sm:$0xff] }
  0x26   :  { %2413 = vmatmul.msk.bf16.vlgmr.msra.gmra.mxu0 %vm163_vm0, %v3318_v6  ;;  %v2866_v38 = vld [vmem:[%s3920_s27 + $0x98] sm:$0xff]  ;;  %v2865_v39 = vld [vmem:[%s3920_s27 + $0x90] sm:$0xff]  ;;  %v2864_v41 = vld [vmem:[%s3920_s27 + $0x88] sm:$0xff] }
  0x27   :  { %443 = vmatpush.bf16.msra.mxu2 %v2861_v21  ;;  %v2863_v42 = vld [vmem:[%s3920_s27 + $0x80] sm:$0xff] }
  0x28   :  { %425 = vmatpush.bf16.msra.mxu1 %v2852_v12  ;;  %v2984_v62 = vld [vmem:[%s3921_s30] ss:$0 sm:$0xff] }
  0x29   :  { %462 = vmatpush.bf16.msra.mxu3 %v2869_v32 }
  0x2b   :  { %444 = vmatpush.bf16.msra.mxu2 %v2860_v22 }
  0x2c   :  { %426 = vmatpush.bf16.msra.mxu1 %v2851_v13 }
  0x2d   :  { %463 = vmatpush.bf16.msra.mxu3 %v2868_v34 }
  0x2f   :  { %445 = vmatpush.bf16.msra.mxu2 %v2859_v23 }
  0x30   :  { %427 = vmatpush.bf16.msra.mxu1 %v2850_v15 }
  0x31   :  { %464 = vmatpush.bf16.msra.mxu3 %v2867_v35 }
  0x33   :  { %446 = vmatpush.bf16.msra.mxu2 %v2858_v24 }
  0x34   :  { %428 = vmatpush.bf16.msra.mxu1 %v2849_v17 }
  0x35   :  { %465 = vmatpush.bf16.msra.mxu3 %v2866_v38 }
  0x36   :  { %2414 = vmatmul.msk.bf16.gmra.mxu0 %vm163_vm0, %v3325_v7 }
  0x37   :  { %447 = vmatpush.bf16.msra.mxu2 %v2857_v25 }
  0x38   :  { %429 = vmatpush.bf16.msra.mxu1 %v2848_v18  ;;  %v2996_v18 = vpop.eup %2995 }
  0x39   :  { %466 = vmatpush.bf16.msra.mxu3 %v2865_v39  ;;  %v496_v25 = vmul.f32 32.0, %v2996_v18  ;;  %vm500_vm1 = vweird.f32 %v2996_v18 }
  0x3b   :  { %448 = vmatpush.bf16.msra.mxu2 %v2856_v27 }
  0x3c   :  { %430 = vmatpush.bf16.msra.mxu1 %v2847_v19 }
  0x3d   :  { %467 = vmatpush.bf16.msra.mxu3 %v2864_v41 }
  0x3f   :  { %449 = vmatpush.bf16.msra.mxu2 %v2855_v28 }
  0x41   :  { %468 = vmatpush.bf16.msra.mxu3 %v2863_v42 }
  0x46   :  { %2415 = vmatmul.msk.bf16.gmra.mxu0 %vm163_vm0, %v3332_v8 }
  0x56   :  { %2416 = vmatmul.msk.bf16.gmra.mxu0 %vm163_vm0, %v3339_v9 }
  0x66   :  { %2417 = vmatmul.msk.bf16.gmra.mxu0 %vm163_vm0, %v3358_v14 }
  0x76   :  { %2418 = vmatmul.msk.bf16.gmra.mxu0 %vm163_vm0, %v3368_v16 }
  0xa3   :  { %v191_v26 = vpop.f32.mrf.mxu0 }
  0xab   :  { %v193_v29 = vpop.f32.mrf.mxu0 }
  0xac   :  { %v269_v30 = vpack.c.bf16 %v193_v29, %v191_v26 }
  0xae   :  { %431 = vmatmul.bf16.vlgmr.msra.gmra.mxu1 %v269_v30  ;;  %v497_v30 = vsub.f32 1.0, %v496_v25 }
  0xb3   :  { %v196_v33 = vpop.f32.mrf.mxu0 }
  0xbb   :  { %v198_v36 = vpop.f32.mrf.mxu0 }
  0xbc   :  { %v272_v37 = vpack.c.bf16 %v198_v36, %v196_v33  ;;  %v498_v33 = vmul.f32 %v2996_v18, %v497_v30  ;;  %v2874_v30 = vld [vmem:[#allocation2 + $0x18] sm:$0xff] }
  0xbe   :  { %436 = vmatmul.bf16.gmra.mxu1 %v272_v37  ;;  %v499_v36 = vadd.f32 %v2996_v18, %v498_v33  ;;  %v2883_v33 = vld [vmem:[#allocation2 + $0x60] sm:$0xff] }
  0xc0   :  { %v3432_v39 = vsel %vm500_vm1, %v2996_v18, %v499_v36  ;;  %v2879_v36 = vld [vmem:[#allocation2 + $0x40] sm:$0xff] }
  0xc3   :  { %v201_v40 = vpop.f32.mrf.mxu0 }
  0xcb   :  { %v203_v43 = vpop.f32.mrf.mxu0 }
  0xcc   :  { %v270_v44 = vpack.c.bf16 %v203_v43, %v201_v40 }
  0xce   :  { %450 = vmatmul.bf16.vlgmr.msra.gmra.mxu2 %v270_v44 }
  0xd3   :  { %v206_v45 = vpop.f32.mrf.mxu0 }
  0xdb   :  { %v208_v46 = vpop.f32.mrf.mxu0 }
  0xdc   :  { %v273_v47 = vpack.c.bf16 %v208_v46, %v206_v45 }
  0xde   :  { %455 = vmatmul.bf16.gmra.mxu2 %v273_v47 }
  0xe3   :  { %v211_v48 = vpop.f32.mrf.mxu0 }
  0xeb   :  { %v213_v49 = vpop.f32.mrf.mxu0 }
  0xec   :  { %v271_v50 = vpack.c.bf16 %v213_v49, %v211_v48 }
  0xee   :  { %469 = vmatmul.bf16.vlgmr.msra.gmra.mxu3 %v271_v50 }
  0xf3   :  { %v216_v51 = vpop.f32.mrf.mxu0 }
  0xfb   :  { %v218_v52 = vpop.f32.mrf.mxu0 }
  0xfc   :  { %v274_v53 = vpack.c.bf16 %v218_v52, %v216_v51 }
  0xfe   :  { %474 = vmatmul.bf16.gmra.mxu3 %v274_v53 }
 0x12b   :  { %v432_v54 = vpop.f32.mrf.mxu1 }
 0x12c   :  { %v433_v0 = vadd.f32 %v2984_v62, %v432_v54 }
 0x133   :  { %v434_v56 = vpop.f32.mrf.mxu1 }
 0x134   :  { %v435_v63 = vadd.f32 %v2984_v62, %v434_v56 }
 0x13b   :  { %v437_v59 = vpop.f32.mrf.mxu1 }
 0x13c   :  { %v438_v1 = vadd.f32 %v2984_v62, %v437_v59 }
 0x143   :  { %v439_v12 = vpop.f32.mrf.mxu1 }
 0x144   :  { %v440_v19 = vadd.f32 %v2984_v62, %v439_v12 }
 0x151   :  { %v451_v55 = vpop.f32.mrf.mxu2 }
 0x152   :  { %v452_v5 = vadd.f32 %v451_v55, %v433_v0 }
 0x159   :  { %v453_v57 = vpop.f32.mrf.mxu2 }
 0x15a   :  { %v454_v2 = vadd.f32 %v453_v57, %v435_v63 }
 0x161   :  { %v456_v61 = vpop.f32.mrf.mxu2 }
 0x162   :  { %v457_v10 = vadd.f32 %v456_v61, %v438_v1  ;;  %v2985_v1 = vld [vmem:[%s3922_s1] ss:$0 sm:$0xff]  ;;  %s3923_s1 = sld [smem:[#allocation17_spill]] }
 0x169   :  { %v458_v17 = vpop.f32.mrf.mxu2 }
 0x16a   :  { %v459_v21 = vadd.f32 %v458_v17, %v440_v19 }
 0x171   :  { %v470_v58 = vpop.f32.mrf.mxu3 }
 0x172   :  { %v471_v13 = vadd.f32 %v470_v58, %v452_v5 }
 0x174   :  { %v480_v22 = vmax.f32 %v471_v13, 0.0 }
 0x179   :  { %v472_v60 = vpop.f32.mrf.mxu3 }
 0x17a   :  { %v473_v11 = vadd.f32 %v472_v60, %v454_v2 }
 0x17c   :  { %v481_v20 = vmax.f32 %v473_v11, 0.0 }
 0x17e   :  { %v486_v26 = vadd.f32 %v481_v20, %v480_v22 }
 0x181   :  { %v475_v4 = vpop.f32.mrf.mxu3 }
 0x182   :  { %v476_v15 = vadd.f32 %v475_v4, %v457_v10  ;;  %v2986_v10 = vld [vmem:[%s3893_s6] ss:$0 sm:$0xff] }
 0x184   :  { %v482_v23 = vmax.f32 %v476_v15, 0.0 }
 0x186   :  { %v487_v28 = vadd.f32 %v486_v26, %v482_v23  ;;  %v2878_v26 = vld [vmem:[#allocation2 + $0x38] sm:$0xff] }
 0x187   :  { %793 = vmatpush.bf16.msrb.mxu2 %v2878_v26 }
 0x189   :  { %v477_v24 = vpop.f32.mrf.mxu3 }
 0x18a   :  { %v478_v27 = vadd.f32 %v477_v24, %v459_v21 }
 0x18c   :  { %v483_v29 = vmax.f32 %v478_v27, 0.0  ;;  %v2877_v27 = vld [vmem:[#allocation2 + $0x30] sm:$0xff] }
 0x18d   :  { %794 = vmatpush.bf16.msrb.mxu2 %v2877_v27 }
 0x18e   :  { %v488_v31 = vadd.f32 %v487_v28, %v483_v29  ;;  %v2876_v28 = vld [vmem:[#allocation2 + $0x28] sm:$0xff] }
 0x190   :  { %v489_v32 = vrot.slane %v488_v31, 4 }
 0x191   :  { %795 = vmatpush.bf16.msrb.mxu2 %v2876_v28 }
 0x192   :  { %v490_v34 = vadd.f32 %v489_v32, %v488_v31  ;;  %v2885_v31 = vld [vmem:[#allocation2 + $0x70] sm:$0xff]  ;;  %v2884_v32 = vld [vmem:[#allocation2 + $0x68] sm:$0xff] }
 0x194   :  { %v491_v35 = vrot.slane %v490_v34, 2 }
 0x196   :  { %v492_v37 = vadd.f32 %v491_v35, %v490_v34  ;;  %v2882_v34 = vld [vmem:[#allocation2 + $0x58] sm:$0xff] }
 0x198   :  { %v493_v38 = vrot.slane %v492_v37, 1 }
 0x19a   :  { %v494_v40 = vadd.f32 %v493_v38, %v492_v37 }
 0x19c   :  { %v502_v41 = vmul.f32 %v3432_v39, %v494_v40  ;;  %v2894_v40 = vld [vmem:[#allocation2 + $0xb8] sm:$0xff] }
 0x19e   :  { %v503_v42 = vsub.f32 %v480_v22, %v502_v41  ;;  %v504_v43 = vsub.f32 %v481_v20, %v502_v41  ;;  %v505_v44 = vsub.f32 %v482_v23, %v502_v41  ;;  %v506_v45 = vsub.f32 %v483_v29, %v502_v41  ;;  %v2875_v29 = vld [vmem:[#allocation2 + $0x20] sm:$0xff]  ;;  %v2893_v41 = vld [vmem:[#allocation2 + $0xb0] sm:$0xff] }
 0x19f   :  { %796 = vmatpush.bf16.msrb.mxu2 %v2875_v29 }
 0x1a0   :  { %v507_v46 = vmul.f32 %v503_v42, %v503_v42  ;;  %v508_v47 = vmul.f32 %v504_v43, %v504_v43  ;;  %v509_v48 = vmul.f32 %v505_v44, %v505_v44  ;;  %v510_v50 = vmul.f32 %v506_v45, %v506_v45 }
 0x1a1   :  { %v527_v4 = vmul.f32 %v2985_v1, %v506_v45  ;;  %v526_v5 = vmul.f32 %v2985_v1, %v505_v44  ;;  %v524_v11 = vmul.f32 %v2985_v1, %v503_v42  ;;  %v525_v12 = vmul.f32 %v2985_v1, %v504_v43  ;;  %v2892_v43 = vld [vmem:[#allocation2 + $0xa8] sm:$0xff]  ;;  %v2891_v44 = vld [vmem:[#allocation2 + $0xa0] sm:$0xff] }
 0x1a2   :  { %v511_v49 = vadd.f32 %v508_v47, %v507_v46  ;;  %v2890_v47 = vld [vmem:[#allocation2 + $0x98] sm:$0xff] }
 0x1a3   :  { %797 = vmatpush.bf16.msrb.mxu2 %v2874_v30 }
 0x1a4   :  { %v512_v51 = vadd.f32 %v511_v49, %v509_v48  ;;  %v2889_v48 = vld [vmem:[#allocation2 + $0x90] sm:$0xff] }
 0x1a6   :  { %v513_v52 = vadd.f32 %v512_v51, %v510_v50  ;;  %v2888_v50 = vld [vmem:[#allocation2 + $0x88] sm:$0xff]  ;;  %v2887_v51 = vld [vmem:[#allocation2 + $0x80] sm:$0xff] }
 0x1a8   :  { %v514_v53 = vrot.slane %v513_v52, 4 }
 0x1aa   :  { %v515_v54 = vadd.f32 %v514_v53, %v513_v52 }
 0x1ac   :  { %v516_v55 = vrot.slane %v515_v54, 2 }
 0x1ae   :  { %v517_v56 = vadd.f32 %v516_v55, %v515_v54 }
 0x1b0   :  { %v518_v57 = vrot.slane %v517_v56, 1 }
 0x1b2   :  { %v519_v58 = vadd.f32 %v518_v57, %v517_v56 }
 0x1b4   :  { %v520_v59 = vmul.f32 %v519_v58, %v3432_v39 }
 0x1b6   :  { %v528_v60 = vadd.f32 1e-05, %v520_v59 }
 0x1b8   :  { %2997 = vrsqrt.f32 %v528_v60  ;;  %vm535_vm3 = vweird.f32 %v528_v60 }
 0x1be   :  { %v2998_v61 = vpop.eup %2997 }
 0x1bf   :  { %v530_v62 = vmul.f32 %v2998_v61, %v528_v60  ;;  %vm536_vm2 = vweird.f32 %v2998_v61 }
 0x1c0   :  { %vm537_vm4 = vmor %vm535_vm3, %vm536_vm2 }
 0x1c1   :  { %v531_v63 = vmul.f32 %v2998_v61, %v530_v62 }
 0x1c3   :  { %v532_v0 = vmul.f32 0.5, %v531_v63 }
 0x1c5   :  { %v533_v2 = vsub.f32 1.5, %v532_v0 }
 0x1c7   :  { %v534_v3 = vmul.f32 %v2998_v61, %v533_v2 }
 0x1c9   :  { %v538_v13 = vsel %vm537_vm4, %v2998_v61, %v534_v3 }
 0x1ca   :  { %v541_v15 = vmul.f32 %v538_v13, %v526_v5  ;;  %v542_v17 = vmul.f32 %v538_v13, %v527_v4  ;;  %v539_v18 = vmul.f32 %v538_v13, %v524_v11  ;;  %v540_v19 = vmul.f32 %v538_v13, %v525_v12  ;;  %v2987_v12 = vld [vmem:[%s3895_s8] ss:$0 sm:$0xff]  ;;  %s2353_s8 = sshll.u32 %s3906_s19, 4  ;;  %s2354_s8 = int_to_ptr.hbm [resolvable:$true] %s2353_s8 }
 0x1cc   :  { %v548_v20 = vadd.f32 %v2986_v10, %v541_v15  ;;  %v549_v21 = vadd.f32 %v2986_v10, %v542_v17  ;;  %v546_v23 = vadd.f32 %v2986_v10, %v539_v18  ;;  %v547_v24 = vadd.f32 %v2986_v10, %v540_v19 }
 0x1ce   :  { %v551_v22 = vpack.c.bf16 %v549_v21, %v548_v20  ;;  %v550_v25 = vpack.c.bf16 %v547_v24, %v546_v23 }
 0x1d0   :  { %558 = vmatpush.bf16.msrb.mxu1 %v551_v22 }
 0x1d4   :  { %559 = vmatpush.bf16.msrb.mxu1 %v550_v25 }
 0x1d7   :  { %2515 = vmatmul.msk.bf16.vlgmr.msrb.gmra.mxu1 %vm163_vm0, %v3318_v6  ;;  %v2873_v6 = vld [vmem:[#allocation2 + $0x10] sm:$0xff] }
 0x1d8   :  { %798 = vmatpush.bf16.msrb.mxu2 %v2873_v6 }
 0x1e7   :  { %2516 = vmatmul.msk.bf16.gmra.mxu1 %vm163_vm0, %v3325_v7  ;;  %v2872_v7 = vld [vmem:[#allocation2 + $0x8] sm:$0xff] }
 0x1e8   :  { %799 = vmatpush.bf16.msrb.mxu2 %v2872_v7 }
 0x1f7   :  { %2517 = vmatmul.msk.bf16.gmra.mxu1 %vm163_vm0, %v3332_v8  ;;  %v2871_v8 = vld [vmem:[#allocation2] sm:$0xff] }
 0x1f8   :  { %800 = vmatpush.bf16.msrb.mxu2 %v2871_v8 }
 0x1fc   :  { %831 = vmatpush.bf16.msra.mxu2 %v2894_v40 }
 0x200   :  { %832 = vmatpush.bf16.msra.mxu2 %v2893_v41 }
 0x204   :  { %833 = vmatpush.bf16.msra.mxu2 %v2892_v43 }
 0x207   :  { %2518 = vmatmul.msk.bf16.gmra.mxu1 %vm163_vm0, %v3339_v9  ;;  %v2886_v9 = vld [vmem:[#allocation2 + $0x78] sm:$0xff] }
 0x208   :  { %812 = vmatpush.bf16.msrb.mxu3 %v2886_v9  ;;  %834 = vmatpush.bf16.msra.mxu2 %v2891_v44 }
 0x20c   :  { %813 = vmatpush.bf16.msrb.mxu3 %v2885_v31  ;;  %835 = vmatpush.bf16.msra.mxu2 %v2890_v47 }
 0x210   :  { %814 = vmatpush.bf16.msrb.mxu3 %v2884_v32  ;;  %836 = vmatpush.bf16.msra.mxu2 %v2889_v48 }
 0x214   :  { %815 = vmatpush.bf16.msrb.mxu3 %v2883_v33  ;;  %837 = vmatpush.bf16.msra.mxu2 %v2888_v50 }
 0x217   :  { %2519 = vmatmul.msk.bf16.gmra.mxu1 %vm163_vm0, %v3358_v14  ;;  %v2881_v14 = vld [vmem:[#allocation2 + $0x50] sm:$0xff] }
 0x218   :  { %816 = vmatpush.bf16.msrb.mxu3 %v2882_v34  ;;  %838 = vmatpush.bf16.msra.mxu2 %v2887_v51 }
 0x21c   :  { %817 = vmatpush.bf16.msrb.mxu3 %v2881_v14 }
 0x227   :  { %2520 = vmatmul.msk.bf16.gmra.mxu1 %vm163_vm0, %v3368_v16  ;;  %v2880_v16 = vld [vmem:[#allocation2 + $0x48] sm:$0xff] }
 0x228   :  { %818 = vmatpush.bf16.msrb.mxu3 %v2880_v16 }
 0x22c   :  { %819 = vmatpush.bf16.msrb.mxu3 %v2879_v36 }
 0x254   :  { %v561_v35 = vpop.f32.mrf.mxu1 }
 0x25c   :  { %v563_v37 = vpop.f32.mrf.mxu1 }
 0x25d   :  { %v639_v38 = vpack.c.bf16 %v563_v37, %v561_v35 }
 0x25f   :  { %801 = vmatmul.bf16.vlgmr.msrb.gmra.mxu2 %v639_v38 }
 0x264   :  { %v566_v42 = vpop.f32.mrf.mxu1 }
 0x26c   :  { %v568_v45 = vpop.f32.mrf.mxu1 }
 0x26d   :  { %v642_v46 = vpack.c.bf16 %v568_v45, %v566_v42 }
 0x26f   :  { %806 = vmatmul.bf16.gmra.mxu2 %v642_v46 }
 0x274   :  { %v571_v49 = vpop.f32.mrf.mxu1 }
 0x27c   :  { %v573_v52 = vpop.f32.mrf.mxu1 }
 0x27d   :  { %v640_v53 = vpack.c.bf16 %v573_v52, %v571_v49 }
 0x27f   :  { %820 = vmatmul.bf16.vlgmr.msrb.gmra.mxu3 %v640_v53 }
 0x284   :  { %v576_v54 = vpop.f32.mrf.mxu1 }
 0x28c   :  { %v578_v55 = vpop.f32.mrf.mxu1 }
 0x28d   :  { %v643_v56 = vpack.c.bf16 %v578_v55, %v576_v54 }
 0x28f   :  { %825 = vmatmul.bf16.gmra.mxu3 %v643_v56 }
 0x294   :  { %v581_v57 = vpop.f32.mrf.mxu1 }
 0x29c   :  { %v583_v58 = vpop.f32.mrf.mxu1 }
 0x29d   :  { %v641_v59 = vpack.c.bf16 %v583_v58, %v581_v57  ;;  %v992_v58 = vld [vmem:[%s3899_s12 + $0x78] sm:$0xff] }
 0x29e   :  { %993 = vmatpush.msra.mxu3 %v992_v58 }
 0x29f   :  { %839 = vmatmul.bf16.vlgmr.msra.gmra.mxu2 %v641_v59  ;;  %v991_v59 = vld [vmem:[%s3899_s12 + $0x70] sm:$0xff] }
 0x2a0   :  { %994 = vmatpush.msra.mxu3 %v991_v59 }
 0x2a4   :  { %v586_v60 = vpop.f32.mrf.mxu1 }
 0x2ac   :  { %v588_v61 = vpop.f32.mrf.mxu1 }
 0x2ad   :  { %v644_v62 = vpack.c.bf16 %v588_v61, %v586_v60  ;;  %v990_v60 = vld [vmem:[%s3899_s12 + $0x68] sm:$0xff]  ;;  %v989_v61 = vld [vmem:[%s3899_s12 + $0x60] sm:$0xff] }
 0x2ae   :  { %995 = vmatpush.msra.mxu3 %v990_v60 }
 0x2af   :  { %844 = vmatmul.bf16.gmra.mxu2 %v644_v62 }
 0x2b0   :  { %996 = vmatpush.msra.mxu3 %v989_v61 }
 0x2e2   :  { %v802_v63 = vpop.f32.mrf.mxu2 }
 0x2e3   :  { %v803_v15 = vadd.f32 %v2987_v12, %v802_v63  ;;  %v988_v63 = vld [vmem:[%s3899_s12 + $0x58] sm:$0xff] }
 0x2e4   :  { %997 = vmatpush.msra.mxu3 %v988_v63 }
 0x2ea   :  { %v804_v0 = vpop.f32.mrf.mxu2 }
 0x2eb   :  { %v805_v13 = vadd.f32 %v2987_v12, %v804_v0 }
 0x2f2   :  { %v807_v1 = vpop.f32.mrf.mxu2 }
 0x2f3   :  { %v808_v17 = vadd.f32 %v2987_v12, %v807_v1 }
 0x2fa   :  { %v809_v3 = vpop.f32.mrf.mxu2 }
 0x2fb   :  { %v810_v26 = vadd.f32 %v2987_v12, %v809_v3  ;;  %v2988_v3 = vld [vmem:[%s3896_s9] ss:$0 sm:$0xff] }
 0x2fc   :  { %v2989_v12 = vld [vmem:[%s3897_s10] ss:$0 sm:$0xff] }
 0x302   :  { %v821_v2 = vpop.f32.mrf.mxu3 }
 0x303   :  { %v822_v20 = vadd.f32 %v821_v2, %v803_v15 }
 0x30a   :  { %v823_v4 = vpop.f32.mrf.mxu3 }
 0x30b   :  { %v824_v18 = vadd.f32 %v823_v4, %v805_v13 }
 0x312   :  { %v826_v11 = vpop.f32.mrf.mxu3 }
 0x313   :  { %v827_v21 = vadd.f32 %v826_v11, %v808_v17 }
 0x31a   :  { %v828_v25 = vpop.f32.mrf.mxu3 }
 0x31b   :  { %v829_v28 = vadd.f32 %v828_v25, %v810_v26 }
 0x322   :  { %v840_v5 = vpop.f32.mrf.mxu2 }
 0x323   :  { %v841_v23 = vadd.f32 %v840_v5, %v822_v20 }
 0x325   :  { %v850_v29 = vmax.f32 %v841_v23, 0.0 }
 0x32a   :  { %v842_v10 = vpop.f32.mrf.mxu2 }
 0x32b   :  { %v843_v22 = vadd.f32 %v842_v10, %v824_v18 }
 0x32d   :  { %v851_v27 = vmax.f32 %v843_v22, 0.0 }
 0x32f   :  { %v856_v7 = vadd.f32 %v851_v27, %v850_v29 }
 0x332   :  { %v845_v19 = vpop.f32.mrf.mxu2 }
 0x333   :  { %v846_v24 = vadd.f32 %v845_v19, %v827_v21 }
 0x335   :  { %v852_v30 = vmax.f32 %v846_v24, 0.0 }
 0x337   :  { %v857_v9 = vadd.f32 %v856_v7, %v852_v30  ;;  %v985_v7 = vld [vmem:[%s3899_s12 + $0x40] sm:$0xff] }
 0x33a   :  { %v847_v6 = vpop.f32.mrf.mxu2 }
 0x33b   :  { %v848_v8 = vadd.f32 %v847_v6, %v829_v28  ;;  %v986_v6 = vld [vmem:[%s3899_s12 + $0x48] sm:$0xff] }
 0x33d   :  { %v853_v31 = vmax.f32 %v848_v8, 0.0  ;;  %v984_v8 = vld [vmem:[%s3899_s12 + $0x38] sm:$0xff] }
 0x33f   :  { %v858_v32 = vadd.f32 %v857_v9, %v853_v31  ;;  %v983_v9 = vld [vmem:[%s3899_s12 + $0x30] sm:$0xff] }
 0x341   :  { %v859_v33 = vrot.slane %v858_v32, 4 }
 0x343   :  { %v860_v34 = vadd.f32 %v859_v33, %v858_v32  ;;  %v981_v32 = vld [vmem:[%s3899_s12 + $0x20] sm:$0xff]  ;;  %v980_v33 = vld [vmem:[%s3899_s12 + $0x18] sm:$0xff] }
 0x345   :  { %v861_v14 = vrot.slane %v860_v34, 2 }
 0x347   :  { %v862_v35 = vadd.f32 %v861_v14, %v860_v34  ;;  %v979_v34 = vld [vmem:[%s3899_s12 + $0x10] sm:$0xff]  ;;  %v978_v14 = vld [vmem:[%s3899_s12 + $0x8] sm:$0xff] }
 0x349   :  { %v863_v16 = vrot.slane %v862_v35, 1 }
 0x34b   :  { %v864_v36 = vadd.f32 %v863_v16, %v862_v35  ;;  %v977_v35 = vld [vmem:[%s3899_s12] sm:$0xff] }
 0x34d   :  { %v865_v37 = vmul.f32 %v864_v36, %v3432_v39 }
 0x34f   :  { %v866_v38 = vsub.f32 %v850_v29, %v865_v37  ;;  %v867_v40 = vsub.f32 %v851_v27, %v865_v37  ;;  %v868_v41 = vsub.f32 %v852_v30, %v865_v37  ;;  %v869_v42 = vsub.f32 %v853_v31, %v865_v37  ;;  %v987_v30 = vld [vmem:[%s3899_s12 + $0x50] sm:$0xff]  ;;  %v982_v31 = vld [vmem:[%s3899_s12 + $0x28] sm:$0xff] }
 0x350   :  { %998 = vmatpush.msra.mxu3 %v987_v30 }
 0x351   :  { %v870_v43 = vmul.f32 %v866_v38, %v866_v38  ;;  %v871_v44 = vmul.f32 %v867_v40, %v867_v40  ;;  %v872_v45 = vmul.f32 %v868_v41, %v868_v41  ;;  %v873_v47 = vmul.f32 %v869_v42, %v869_v42 }
 0x352   :  { %v890_v10 = vmul.f32 %v2988_v3, %v869_v42  ;;  %v889_v11 = vmul.f32 %v2988_v3, %v868_v41  ;;  %v887_v13 = vmul.f32 %v2988_v3, %v866_v38  ;;  %v888_v15 = vmul.f32 %v2988_v3, %v867_v40  ;;  %999 = vmatpush.msra.mxu3 %v986_v6  ;;  %v1079_v6 = vld [vmem:[%s3898_s11 + $0x28] sm:$0xff] }
 0x353   :  { %v874_v46 = vadd.f32 %v871_v44, %v870_v43 }
 0x354   :  { %1000 = vmatpush.msra.mxu3 %v985_v7 }
 0x355   :  { %v875_v48 = vadd.f32 %v874_v46, %v872_v45 }
 0x356   :  { %1001 = vmatpush.msra.mxu3 %v984_v8  ;;  %v1078_v8 = vld [vmem:[%s3898_s11 + $0x20] sm:$0xff] }
 0x357   :  { %v876_v49 = vadd.f32 %v875_v48, %v873_v47 }
 0x358   :  { %1002 = vmatpush.msra.mxu3 %v983_v9 }
 0x359   :  { %v877_v50 = vrot.slane %v876_v49, 4 }
 0x35a   :  { %1003 = vmatpush.msra.mxu3 %v982_v31 }
 0x35b   :  { %v878_v51 = vadd.f32 %v877_v50, %v876_v49 }
 0x35c   :  { %1004 = vmatpush.msra.mxu3 %v981_v32 }
 0x35d   :  { %v879_v52 = vrot.slane %v878_v51, 2 }
 0x35e   :  { %1005 = vmatpush.msra.mxu3 %v980_v33 }
 0x35f   :  { %v880_v53 = vadd.f32 %v879_v52, %v878_v51 }
 0x360   :  { %1006 = vmatpush.msra.mxu3 %v979_v34 }
 0x361   :  { %v881_v54 = vrot.slane %v880_v53, 1 }
 0x362   :  { %1007 = vmatpush.msra.mxu3 %v978_v14 }
 0x363   :  { %v882_v55 = vadd.f32 %v881_v54, %v880_v53 }
 0x364   :  { %1008 = vmatpush.msra.mxu3 %v977_v35 }
 0x365   :  { %v883_v56 = vmul.f32 %v882_v55, %v3432_v39 }
 0x367   :  { %v891_v57 = vadd.f32 1e-05, %v883_v56 }
 0x369   :  { %2999 = vrsqrt.f32 %v891_v57  ;;  %vm898_vm6 = vweird.f32 %v891_v57 }
 0x36f   :  { %v3000_v62 = vpop.eup %2999 }
 0x370   :  { %v893_v0 = vmul.f32 %v3000_v62, %v891_v57  ;;  %vm899_vm5 = vweird.f32 %v3000_v62 }
 0x371   :  { %vm900_vm7 = vmor %vm898_vm6, %vm899_vm5  ;;  %vm1024_vm5 = vcmask 523264  }
 0x372   :  { %v894_v1 = vmul.f32 %v3000_v62, %v893_v0 }
 0x374   :  { %v895_v2 = vmul.f32 0.5, %v894_v1 }
 0x376   :  { %v896_v4 = vsub.f32 1.5, %v895_v2 }
 0x378   :  { %v897_v5 = vmul.f32 %v3000_v62, %v896_v4 }
 0x37a   :  { %v901_v17 = vsel %vm900_vm7, %v3000_v62, %v897_v5 }
 0x37b   :  { %v904_v18 = vmul.f32 %v901_v17, %v889_v11  ;;  %v902_v19 = vmul.f32 %v901_v17, %v887_v13  ;;  %v905_v20 = vmul.f32 %v901_v17, %v890_v10  ;;  %v903_v21 = vmul.f32 %v901_v17, %v888_v15 }
 0x37d   :  { %v3480_v22 = vadd.f32 %v2989_v12, %v904_v18  ;;  %v3482_v23 = vadd.f32 %v2989_v12, %v902_v19  ;;  %v3484_v24 = vadd.f32 %v2989_v12, %v905_v20  ;;  %v3486_v25 = vadd.f32 %v2989_v12, %v903_v21 }
 0x37f   :  { %v919_v26 = vmul.f32 %v3480_v22, %v3480_v22  ;;  %915 = vst [vmem:[#allocation8 + $0x10] sm:$0xff] %v3480_v22  ;;  %v917_v27 = vmul.f32 %v3482_v23, %v3482_v23  ;;  %v920_v28 = vmul.f32 %v3484_v24, %v3484_v24  ;;  %v918_v29 = vmul.f32 %v3486_v25, %v3486_v25 }
 0x380   :  { %913 = vst [vmem:[#allocation8] sm:$0xff] %v3482_v23 }
 0x381   :  { %925 = vadd.xlane.f32.xlu1 %v919_v26  ;;  %921 = vadd.xlane.f32.xlu0 %v917_v27  ;;  %916 = vst [vmem:[#allocation8 + $0x18] sm:$0xff] %v3484_v24 }
 0x382   :  { %914 = vst [vmem:[#allocation8 + $0x8] sm:$0xff] %v3486_v25 }
 0x389   :  { %927 = vadd.xlane.f32.xlu1 %v920_v28  ;;  %923 = vadd.xlane.f32.xlu0 %v918_v29  ;;  %v1081_v28 = vld [vmem:[%s3898_s11 + $0x38] sm:$0xff]  ;;  %v1080_v29 = vld [vmem:[%s3898_s11 + $0x30] sm:$0xff] }
 0x38a   :  { %1102 = vmatpush.msrb.mxu0 %v1081_v28 }
 0x38c   :  { %1103 = vmatpush.msrb.mxu0 %v1080_v29 }
 0x38e   :  { %1104 = vmatpush.msrb.mxu0 %v1079_v6 }
 0x390   :  { %1105 = vmatpush.msrb.mxu0 %v1078_v8 }
 0x3f4   :  { %v926_v16 = vpop.xlane.xlu1 %925  ;;  %v922_v36 = vpop.xlane.xlu0 %921 }
 0x3f5   :  { %v929_v37 = vmax.f32 %v922_v36, 1e-24  ;;  %v931_v38 = vmax.f32 %v926_v16, 1e-24 }
 0x3f7   :  { %3001 = vrsqrt.f32 %v929_v37  ;;  %vm939_vm9 = vweird.f32 %v929_v37  ;;  %vm959_vm15 = vweird.f32 %v931_v38 }
 0x3f8   :  { %3003 = vrsqrt.f32 %v931_v38 }
 0x3fc   :  { %v928_v40 = vpop.xlane.xlu1 %927  ;;  %v924_v41 = vpop.xlane.xlu0 %923 }
 0x3fd   :  { %v930_v42 = vmax.f32 %v924_v41, 1e-24  ;;  %v3002_v43 = vpop.eup %3001  ;;  %v932_v44 = vmax.f32 %v928_v40, 1e-24  ;;  %v1077_v40 = vld [vmem:[%s3898_s11 + $0x18] sm:$0xff]  ;;  %v1076_v41 = vld [vmem:[%s3898_s11 + $0x10] sm:$0xff] }
 0x3fe   :  { %v934_v45 = vmul.f32 %v3002_v43, %v929_v37  ;;  %v3004_v46 = vpop.eup %3003  ;;  %vm940_vm8 = vweird.f32 %v3002_v43  ;;  %1106 = vmatpush.msrb.mxu0 %v1077_v40 }
 0x3ff   :  { %3005 = vrsqrt.f32 %v930_v42  ;;  %v954_v48 = vmul.f32 %v3004_v46, %v931_v38  ;;  %vm941_vm10 = vmor %vm939_vm9, %vm940_vm8  ;;  %vm949_vm12 = vweird.f32 %v930_v42  ;;  %vm960_vm14 = vweird.f32 %v3004_v46 }
 0x400   :  { %v935_v47 = vmul.f32 %v3002_v43, %v934_v45  ;;  %3007 = vrsqrt.f32 %v932_v44  ;;  %vm961_vm1 = vmor %vm959_vm15, %vm960_vm14  ;;  %vm969_vm3 = vweird.f32 %v932_v44  ;;  %1107 = vmatpush.msrb.mxu0 %v1076_v41 }
 0x401   :  { %v955_v52 = vmul.f32 %v3004_v46, %v954_v48 }
 0x402   :  { %v936_v49 = vmul.f32 0.5, %v935_v47 }
 0x403   :  { %v956_v59 = vmul.f32 0.5, %v955_v52 }
 0x404   :  { %v937_v50 = vsub.f32 1.5, %v936_v49  ;;  %v2990_v49 = vld [vmem:[%s3923_s1] ss:$0 sm:$0xff] }
 0x405   :  { %v3006_v51 = vpop.eup %3005  ;;  %v957_v63 = vsub.f32 1.5, %v956_v59 }
 0x406   :  { %v938_v53 = vmul.f32 %v3002_v43, %v937_v50  ;;  %v944_v54 = vmul.f32 %v3006_v51, %v930_v42  ;;  %v3008_v55 = vpop.eup %3007  ;;  %vm950_vm11 = vweird.f32 %v3006_v51  ;;  %v1075_v42 = vld [vmem:[%s3898_s11 + $0x8] sm:$0xff]  ;;  %v3177_v50 = vmov 0.0  }
 0x407   :  { %v964_v60 = vmul.f32 %v3008_v55, %v932_v44  ;;  %vm951_vm13 = vmor %vm949_vm12, %vm950_vm11  ;;  %v958_v5 = vmul.f32 %v3004_v46, %v957_v63  ;;  %vm970_vm2 = vweird.f32 %v3008_v55  ;;  %1108 = vmatpush.msrb.mxu0 %v1075_v42 }
 0x408   :  { %v942_v56 = vsel %vm941_vm10, %v3002_v43, %v938_v53  ;;  %v945_v57 = vmul.f32 %v3006_v51, %v944_v54  ;;  %vm971_vm4 = vmor %vm969_vm3, %vm970_vm2  ;;  %v1074_v43 = vld [vmem:[%s3898_s11] sm:$0xff] }
 0x409   :  { %v3534_v58 = vmul.f32 %v942_v56, %v3482_v23  ;;  %v965_v0 = vmul.f32 %v3008_v55, %v964_v60  ;;  %v962_v11 = vsel %vm961_vm1, %v3004_v46, %v958_v5  ;;  %1109 = vmatpush.msrb.mxu0 %v1074_v43 }
 0x40a   :  { %v946_v61 = vmul.f32 0.5, %v945_v57  ;;  %v3542_v12 = vmul.f32 %v962_v11, %v3480_v22 }
 0x40b   :  { %1009 = vmatmul.f32.vlgmr.msra.gmra.mxu3 %v3534_v58  ;;  %v966_v4 = vmul.f32 0.5, %v965_v0 }
 0x40c   :  { %v947_v62 = vsub.f32 1.5, %v946_v61 }
 0x40d   :  { %v967_v10 = vsub.f32 1.5, %v966_v4 }
 0x40e   :  { %v948_v1 = vmul.f32 %v3006_v51, %v947_v62 }
 0x40f   :  { %v968_v13 = vmul.f32 %v3008_v55, %v967_v10 }
 0x410   :  { %v952_v2 = vsel %vm951_vm13, %v3006_v51, %v948_v1 }
 0x411   :  { %v3538_v3 = vmul.f32 %v952_v2, %v3486_v25  ;;  %v972_v15 = vsel %vm971_vm4, %v3008_v55, %v968_v13 }
 0x412   :  { %v3546_v17 = vmul.f32 %v972_v15, %v3484_v24  ;;  %v1022_v24 = vlaneseq }
 0x413   :  { %1012 = vmatmul.f32.gmra.mxu3 %v3538_v3 }
 0x414   :  { %v3553_v27 = vand.u32 127, %v1022_v24  ;;  %v2117_v24 = vld [vmem:[%s3918_s26 + $0x10] sm:$0xff] }
 0x415   :  { %v2214_v28 = vmul.f32 %v2117_v24, %v2117_v24  ;;  %v2914_v24 = vld [vmem:[#allocation5 + $0x98] sm:$0xff] }
 0x416   :  { %v1041_v30 = vcvt.s32.f32 %v3553_v27 }
 0x41b   :  { %1015 = vmatmul.f32.gmra.mxu3 %v3542_v12 }
 0x423   :  { %1018 = vmatmul.f32.gmra.mxu3 %v3546_v17 }
 0x48e   :  { %v1010_v18 = vpop.f32.mrf.mxu3 }
 0x48f   :  { %v1025_v19 = vsel %vm1024_vm5, %v1010_v18, -inf }
 0x490   :  { %1026 = vmax.xlane.f32.xlu2 %v1025_v19 }
 0x496   :  { %v1013_v20 = vpop.f32.mrf.mxu3 }
 0x497   :  { %v1028_v21 = vsel %vm1024_vm5, %v1013_v20, -inf }
 0x498   :  { %1029 = vmax.xlane.f32.xlu2 %v1028_v21 }
 0x49e   :  { %v1016_v22 = vpop.f32.mrf.mxu3 }
 0x49f   :  { %v1031_v23 = vsel %vm1024_vm5, %v1016_v22, -inf }
 0x4a0   :  { %1032 = vmax.xlane.f32.xlu0 %v1031_v23 }
 0x4a6   :  { %v1019_v25 = vpop.f32.mrf.mxu3 }
 0x4a7   :  { %v1034_v26 = vsel %vm1024_vm5, %v1019_v25, -inf }
 0x4a8   :  { %1035 = vmax.xlane.f32.xlu1 %v1034_v26 }
 0x503   :  { %v1027_v7 = vpop.xlane.xlu2 %1026 }
 0x504   :  { %vm1037_vm6 = vcmp.ge.f32.partialorder %v1010_v18, %v1027_v7 }
 0x505   :  { %v1042_v9 = vsel %vm1037_vm6, %v1041_v30, 64.0 }
 0x506   :  { %v1046_v31 = vsel %vm1024_vm5, %v1042_v9, inf }
 0x507   :  { %1047 = vmin.xlane.f32.xlu2 %v1046_v31 }
 0x50b   :  { %v1030_v32 = vpop.xlane.xlu2 %1029 }
 0x50c   :  { %vm1038_vm7 = vcmp.ge.f32.partialorder %v1013_v20, %v1030_v32 }
 0x50d   :  { %v1043_v33 = vsel %vm1038_vm7, %v1041_v30, 64.0 }
 0x50e   :  { %v1049_v34 = vsel %vm1024_vm5, %v1043_v33, inf }
 0x50f   :  { %1050 = vmin.xlane.f32.xlu0 %v1049_v34 }
 0x513   :  { %v1033_v14 = vpop.xlane.xlu0 %1032 }
 0x514   :  { %vm1039_vm8 = vcmp.ge.f32.partialorder %v1016_v22, %v1033_v14 }
 0x515   :  { %v1044_v35 = vsel %vm1039_vm8, %v1041_v30, 64.0 }
 0x516   :  { %v1052_v16 = vsel %vm1024_vm5, %v1044_v35, inf }
 0x517   :  { %1053 = vmin.xlane.f32.xlu1 %v1052_v16 }
 0x51b   :  { %v1036_v36 = vpop.xlane.xlu1 %1035 }
 0x51c   :  { %vm1040_vm9 = vcmp.ge.f32.partialorder %v1019_v25, %v1036_v36  ;;  %v3602_v25 = vld [vmem:[%s3918_s26] sm:$0xff] }
 0x51d   :  { %v1045_v37 = vsel %vm1040_vm9, %v1041_v30, 64.0  ;;  %v2212_v26 = vmul.f32 %v3602_v25, %v3602_v25 }
 0x51e   :  { %v1055_v38 = vsel %vm1024_vm5, %v1045_v37, inf }
 0x51f   :  { %1056 = vmin.xlane.f32.xlu2 %v1055_v38 }
 0x57a   :  { %v1048_v44 = vpop.xlane.xlu2 %1047 }
 0x57b   :  { %vm2951_vm10 = vcmp.lt.s32.totalorder %v1048_v44, 0  ;;  %v2952_v45 = vceil.f32 %v1048_v44  ;;  %v2953_v46 = vfloor.f32 %v1048_v44 }
 0x57d   :  { %v2954_v47 = vsel %vm2951_vm10, %v2952_v45, %v2953_v46  ;;  %v3637_v45 = vld [vmem:[%s3919_s5] sm:$0xff]  ;;  %v3646_v46 = vld [vmem:[%s3919_s5 + $0x8] sm:$0xff] }
 0x57e   :  { %v2955_v48 = vcvt.f32.s32 %v2954_v47  ;;  %v3655_v47 = vld [vmem:[%s3919_s5 + $0x10] sm:$0xff] }
 0x580   :  { %vm1062_vm11 = vcmp.eq.s32.totalorder %v3553_v27, %v2955_v48  ;;  %v3664_v48 = vld [vmem:[%s3919_s5 + $0x18] sm:$0xff] }
 0x581   :  { %v2617_v51 = vsel %vm1062_vm11, 1.0, %v3177_v50 }
 0x582   :  { %2621 = vmatmul.msk.f32.vlgmr.msrb.gmra.mxu0 %vm1024_vm5, %v2617_v51  ;;  %v1051_v52 = vpop.xlane.xlu0 %1050  ;;  %v1127_v53 = vmul.f32 %v2990_v49, %v2617_v51  ;;  %v2901_v51 = vld [vmem:[#allocation5 + $0x30] sm:$0xff] }
 0x583   :  { %vm2956_vm12 = vcmp.lt.s32.totalorder %v1051_v52, 0  ;;  %v2957_v54 = vceil.f32 %v1051_v52  ;;  %v2958_v55 = vfloor.f32 %v1051_v52  ;;  %v2900_v52 = vld [vmem:[#allocation5 + $0x28] sm:$0xff] }
 0x584   :  { %v1131_v56 = vsel %vm1024_vm5, %v1127_v53, 0.0  ;;  %v2899_v53 = vld [vmem:[#allocation5 + $0x20] sm:$0xff] }
 0x585   :  { %1132 = vadd.xlane.f32.xlu2 %v1131_v56  ;;  %v2959_v57 = vsel %vm2956_vm12, %v2957_v54, %v2958_v55  ;;  %v2898_v54 = vld [vmem:[#allocation5 + $0x18] sm:$0xff]  ;;  %v3682_v55 = vld [vmem:[%s3919_s5 + $0x28] sm:$0xff]  ;;  %v2897_v56 = vld [vmem:[#allocation5 + $0x10] sm:$0xff] }
 0x586   :  { %v2960_v59 = vcvt.f32.s32 %v2959_v57  ;;  %v2896_v57 = vld [vmem:[#allocation5 + $0x8] sm:$0xff] }
 0x588   :  { %vm1063_vm13 = vcmp.eq.s32.totalorder %v3553_v27, %v2960_v59  ;;  %v2895_v59 = vld [vmem:[#allocation5] sm:$0xff] }
 0x589   :  { %v2618_v60 = vsel %vm1063_vm13, 1.0, %v3177_v50 }
 0x58a   :  { %2622 = vmatmul.msk.f32.gmra.mxu0 %vm1024_vm5, %v2618_v60  ;;  %v1054_v61 = vpop.xlane.xlu1 %1053  ;;  %v1128_v19 = vmul.f32 %v2990_v49, %v2618_v60  ;;  %v2910_v60 = vld [vmem:[#allocation5 + $0x78] sm:$0xff] }
 0x58b   :  { %vm2961_vm14 = vcmp.lt.s32.totalorder %v1054_v61, 0  ;;  %v2962_v62 = vceil.f32 %v1054_v61  ;;  %v2963_v63 = vfloor.f32 %v1054_v61  ;;  %1492 = vmatpush.bf16.msra.mxu1 %v2910_v60  ;;  %v2909_v61 = vld [vmem:[#allocation5 + $0x70] sm:$0xff] }
 0x58c   :  { %v1134_v23 = vsel %vm1024_vm5, %v1128_v19, 0.0  ;;  %v2917_v19 = vld [vmem:[#allocation5 + $0xb0] sm:$0xff] }
 0x58d   :  { %v2964_v0 = vsel %vm2961_vm14, %v2962_v62, %v2963_v63  ;;  %v2908_v62 = vld [vmem:[#allocation5 + $0x68] sm:$0xff]  ;;  %v2907_v63 = vld [vmem:[#allocation5 + $0x60] sm:$0xff] }
 0x58e   :  { %v2965_v1 = vcvt.f32.s32 %v2964_v0  ;;  %v2906_v0 = vld [vmem:[#allocation5 + $0x58] sm:$0xff] }
 0x58f   :  { %1493 = vmatpush.bf16.msra.mxu1 %v2909_v61 }
 0x590   :  { %vm1064_vm15 = vcmp.eq.s32.totalorder %v3553_v27, %v2965_v1 }
 0x591   :  { %v2619_v2 = vsel %vm1064_vm15, 1.0, %v3177_v50 }
 0x592   :  { %v1057_v4 = vpop.xlane.xlu2 %1056  ;;  %2623 = vmatmul.msk.f32.gmra.mxu0 %vm1024_vm5, %v2619_v2  ;;  %v1129_v5 = vmul.f32 %v2990_v49, %v2619_v2  ;;  %v2905_v2 = vld [vmem:[#allocation5 + $0x50] sm:$0xff] }
 0x593   :  { %vm2966_vm1 = vcmp.lt.s32.totalorder %v1057_v4, 0  ;;  %v2967_v10 = vceil.f32 %v1057_v4  ;;  %v2968_v11 = vfloor.f32 %v1057_v4  ;;  %1494 = vmatpush.bf16.msra.mxu1 %v2908_v62  ;;  %v2904_v4 = vld [vmem:[#allocation5 + $0x48] sm:$0xff] }
 0x594   :  { %v1137_v13 = vsel %vm1024_vm5, %v1129_v5, 0.0 }
 0x595   :  { %1138 = vadd.xlane.f32.xlu0 %v1137_v13  ;;  %v2969_v15 = vsel %vm2966_vm1, %v2967_v10, %v2968_v11  ;;  %v2903_v11 = vld [vmem:[#allocation5 + $0x40] sm:$0xff] }
 0x596   :  { %v2970_v18 = vcvt.f32.s32 %v2969_v15  ;;  %v2918_v15 = vld [vmem:[#allocation5 + $0xb8] sm:$0xff] }
 0x597   :  { %1495 = vmatpush.bf16.msra.mxu1 %v2907_v63 }
 0x598   :  { %vm1065_vm2 = vcmp.eq.s32.totalorder %v3553_v27, %v2970_v18 }
 0x599   :  { %v2620_v20 = vsel %vm1065_vm2, 1.0, %v3177_v50  ;;  %v3673_v50 = vld [vmem:[%s3919_s5 + $0x20] sm:$0xff] }
 0x59a   :  { %2624 = vmatmul.msk.f32.gmra.mxu0 %vm1024_vm5, %v2620_v20  ;;  %v1130_v21 = vmul.f32 %v2990_v49, %v2620_v20  ;;  %v2902_v49 = vld [vmem:[#allocation5 + $0x38] sm:$0xff] }
 0x59b   :  { %1473 = vmatpush.bf16.msra.mxu0 %v2902_v49  ;;  %1496 = vmatpush.bf16.msra.mxu1 %v2906_v0 }
 0x59c   :  { %v1140_v22 = vsel %vm1024_vm5, %v1130_v21, 0.0  ;;  %v2916_v21 = vld [vmem:[#allocation5 + $0xa8] sm:$0xff] }
 0x59d   :  { %1141 = vadd.xlane.f32.xlu1 %v1140_v22  ;;  %1135 = vadd.xlane.f32.xlu0 %v1134_v23  ;;  %v2915_v23 = vld [vmem:[#allocation5 + $0xa0] sm:$0xff] }
 0x59f   :  { %1474 = vmatpush.bf16.msra.mxu0 %v2901_v51  ;;  %1497 = vmatpush.bf16.msra.mxu1 %v2905_v2 }
 0x5a3   :  { %1475 = vmatpush.bf16.msra.mxu0 %v2900_v52  ;;  %1498 = vmatpush.bf16.msra.mxu1 %v2904_v4 }
 0x5a5   :  { %2216 = vadd.xlane.f32.xlu0 %v2212_v26 }
 0x5a7   :  { %1476 = vmatpush.bf16.msra.mxu0 %v2899_v53  ;;  %1499 = vmatpush.bf16.msra.mxu1 %v2903_v11 }
 0x5ab   :  { %1477 = vmatpush.bf16.msra.mxu0 %v2898_v54  ;;  %1536 = vmatpush.bf16.msrb.mxu1 %v2902_v49 }
 0x5ad   :  { %2220 = vadd.xlane.f32.xlu0 %v2214_v28 }
 0x5af   :  { %1478 = vmatpush.bf16.msra.mxu0 %v2897_v56  ;;  %1537 = vmatpush.bf16.msrb.mxu1 %v2901_v51 }
 0x5b3   :  { %1479 = vmatpush.bf16.msra.mxu0 %v2896_v57  ;;  %1538 = vmatpush.bf16.msrb.mxu1 %v2900_v52 }
 0x5b7   :  { %1480 = vmatpush.bf16.msra.mxu0 %v2895_v59  ;;  %1539 = vmatpush.bf16.msrb.mxu1 %v2899_v53 }
 0x5bb   :  { %1511 = vmatpush.bf16.msrb.mxu0 %v2918_v15  ;;  %1540 = vmatpush.bf16.msrb.mxu1 %v2898_v54 }
 0x5bf   :  { %1512 = vmatpush.bf16.msrb.mxu0 %v2917_v19  ;;  %1541 = vmatpush.bf16.msrb.mxu1 %v2897_v56 }
 0x5c3   :  { %1513 = vmatpush.bf16.msrb.mxu0 %v2916_v21  ;;  %1542 = vmatpush.bf16.msrb.mxu1 %v2896_v57 }
 0x5c7   :  { %1514 = vmatpush.bf16.msrb.mxu0 %v2915_v23  ;;  %1543 = vmatpush.bf16.msrb.mxu1 %v2895_v59 }
 0x5cb   :  { %1515 = vmatpush.bf16.msrb.mxu0 %v2914_v24 }
 0x5f8   :  { %v3609_v29 = vpop.xlane.xlu2 %1132 }
 0x5f9   :  { %v1143_v30 = vsub.f32 1.0, %v3609_v29 }
 0x5ff   :  { %v3612_v6 = vpop.f32.mrf.mxu0 }
 0x600   :  { %v1147_v7 = vmul.f32 %v1143_v30, %v3612_v6 }
 0x602   :  { %1185 = vst [vmem:[#allocation9] sm:$0xff] %v1147_v7 }
 0x607   :  { %v1114_v8 = vpop.f32.mrf.mxu0 }
 0x608   :  { %v3615_v9 = vpop.xlane.xlu0 %1138  ;;  %v1152_v31 = vsub.f32 %v1114_v8, %v3538_v3  ;;  %v1238_v43 = vpack.c.bf16 %v1114_v8, %v3612_v6 }
 0x609   :  { %v1145_v33 = vsub.f32 1.0, %v3615_v9 }
 0x60a   :  { %v1156_v32 = vmul.f32 %v1152_v31, %v1152_v31 }
 0x60c   :  { %1161 = vadd.xlane.f32.xlu0 %v1156_v32 }
 0x60f   :  { %v3619_v34 = vpop.f32.mrf.mxu0 }
 0x610   :  { %v1149_v14 = vmul.f32 %v1145_v33, %v3619_v34  ;;  %v3622_v35 = vpop.xlane.xlu0 %1135  ;;  %v3625_v37 = vpop.xlane.xlu1 %1141  ;;  %v2911_v33 = vld [vmem:[#allocation5 + $0x80] sm:$0xff] }
 0x611   :  { %v1144_v16 = vsub.f32 1.0, %v3622_v35  ;;  %v1146_v38 = vsub.f32 1.0, %v3625_v37 }
 0x612   :  { %1187 = vst [vmem:[#allocation9 + $0x10] sm:$0xff] %v1149_v14 }
 0x613   :  { %v1148_v36 = vmul.f32 %v1144_v16, %v1114_v8  ;;  %v2912_v8 = vld [vmem:[#allocation5 + $0x88] sm:$0xff] }
 0x615   :  { %1186 = vst [vmem:[#allocation9 + $0x8] sm:$0xff] %v1148_v36  ;;  %v1239_v44 = vpack.c.bf16 %v1148_v36, %v1147_v7  ;;  %v2913_v7 = vld [vmem:[#allocation5 + $0x90] sm:$0xff] }
 0x616   :  { %1516 = vmatpush.bf16.msrb.mxu0 %v2913_v7 }
 0x617   :  { %v3628_v3 = vpop.f32.mrf.mxu0 }
 0x618   :  { %v1150_v40 = vmul.f32 %v1146_v38, %v3628_v3  ;;  %v1240_v41 = vpack.c.bf16 %v3628_v3, %v3619_v34 }
 0x61a   :  { %1188 = vst [vmem:[#allocation9 + $0x18] sm:$0xff] %v1150_v40  ;;  %1248 = vmatpush.bf16.msrb.mxu2 %v1240_v41  ;;  %v1241_v42 = vpack.c.bf16 %v1150_v40, %v1149_v14  ;;  %1517 = vmatpush.bf16.msrb.mxu0 %v2912_v8 }
 0x61b   :  { %2372 = dma.vmem_to_hbm [thread:$0]  %s2365_s15, 512, %s2367_s0, [#allocation10], %s3179_s7, %s3179_s7, %s3180_s25  }
 0x61c   :  { %1287 = vmatpush.bf16.msrb.mxu3 %v1241_v42 }
 0x61e   :  { %1249 = vmatpush.bf16.msrb.mxu2 %v1238_v43  ;;  %1518 = vmatpush.bf16.msrb.mxu0 %v2911_v33 }
 0x620   :  { %1288 = vmatpush.bf16.msrb.mxu3 %v1239_v44 }
 0x621   :  { %2625 = vmatmul.msk.bf16.vlgmr.msrb.gmra.mxu2 %vm163_vm0, %v3637_v45 }
 0x623   :  { %2631 = vmatmul.msk.bf16.vlgmr.msrb.gmra.mxu3 %vm163_vm0, %v3637_v45 }
 0x631   :  { %2626 = vmatmul.msk.bf16.gmra.mxu2 %vm163_vm0, %v3646_v46 }
 0x633   :  { %2632 = vmatmul.msk.bf16.gmra.mxu3 %vm163_vm0, %v3646_v46 }
 0x641   :  { %2627 = vmatmul.msk.bf16.gmra.mxu2 %vm163_vm0, %v3655_v47 }
 0x643   :  { %2633 = vmatmul.msk.bf16.gmra.mxu3 %vm163_vm0, %v3655_v47 }
 0x651   :  { %2628 = vmatmul.msk.bf16.gmra.mxu2 %vm163_vm0, %v3664_v48 }
 0x653   :  { %2634 = vmatmul.msk.bf16.gmra.mxu3 %vm163_vm0, %v3664_v48 }
 0x661   :  { %2629 = vmatmul.msk.bf16.gmra.mxu2 %vm163_vm0, %v3673_v50 }
 0x663   :  { %2635 = vmatmul.msk.bf16.gmra.mxu3 %vm163_vm0, %v3673_v50 }
 0x671   :  { %2630 = vmatmul.msk.bf16.gmra.mxu2 %vm163_vm0, %v3682_v55 }
 0x673   :  { %2636 = vmatmul.msk.bf16.gmra.mxu3 %vm163_vm0, %v3682_v55 }
 0x6a4   :  { %v1251_v1 = vpop.f32.mrf.mxu2 }
 0x6a6   :  { %v3688_v10 = vpop.f32.mrf.mxu3 }
 0x6ac   :  { %v1253_v5 = vpop.f32.mrf.mxu2 }
 0x6ad   :  { %v1320_v13 = vpack.c.bf16 %v1253_v5, %v1251_v1 }
 0x6ae   :  { %v1292_v20 = vpop.f32.mrf.mxu3 }
 0x6af   :  { %1481 = vmatmul.bf16.vlgmr.msra.gmra.mxu0 %v1320_v13  ;;  %v1530_v49 = vpack.c.bf16 %v1292_v20, %v3688_v10 }
 0x6b0   :  { %1555 = vmatpush.bf16.msra.mxu0 %v2910_v60 }
 0x6b4   :  { %v1256_v18 = vpop.f32.mrf.mxu2  ;;  %1556 = vmatpush.bf16.msra.mxu0 %v2909_v61 }
 0x6b6   :  { %v1295_v28 = vpop.f32.mrf.mxu3 }
 0x6b8   :  { %1557 = vmatpush.bf16.msra.mxu0 %v2908_v62 }
 0x6bc   :  { %v1258_v22 = vpop.f32.mrf.mxu2  ;;  %1558 = vmatpush.bf16.msra.mxu0 %v2907_v63 }
 0x6bd   :  { %v1323_v26 = vpack.c.bf16 %v1258_v22, %v1256_v18 }
 0x6be   :  { %v1297_v31 = vpop.f32.mrf.mxu3 }
 0x6bf   :  { %1486 = vmatmul.bf16.gmra.mxu0 %v1323_v26  ;;  %v1533_v57 = vpack.c.bf16 %v1297_v31, %v1295_v28  ;;  %v2991_v26 = vld [vmem:[%s3901_s14] ss:$0 sm:$0xff] }
 0x6c0   :  { %1559 = vmatpush.bf16.msra.mxu0 %v2906_v0 }
 0x6c4   :  { %v1261_v30 = vpop.f32.mrf.mxu2  ;;  %1560 = vmatpush.bf16.msra.mxu0 %v2905_v2 }
 0x6c6   :  { %v1300_v36 = vpop.f32.mrf.mxu3 }
 0x6c8   :  { %1561 = vmatpush.bf16.msra.mxu0 %v2904_v4 }
 0x6cc   :  { %v1263_v32 = vpop.f32.mrf.mxu2  ;;  %1562 = vmatpush.bf16.msra.mxu0 %v2903_v11 }
 0x6cd   :  { %v1321_v14 = vpack.c.bf16 %v1263_v32, %v1261_v30 }
 0x6ce   :  { %v1302_v41 = vpop.f32.mrf.mxu3 }
 0x6cf   :  { %1500 = vmatmul.bf16.vlgmr.msra.gmra.mxu1 %v1321_v14  ;;  %v1531_v61 = vpack.c.bf16 %v1302_v41, %v1300_v36 }
 0x6d0   :  { %1574 = vmatpush.bf16.msra.mxu1 %v2918_v15 }
 0x6d4   :  { %v1266_v16 = vpop.f32.mrf.mxu2  ;;  %1575 = vmatpush.bf16.msra.mxu1 %v2917_v19 }
 0x6d6   :  { %v1305_v43 = vpop.f32.mrf.mxu3 }
 0x6d8   :  { %1576 = vmatpush.bf16.msra.mxu1 %v2916_v21 }
 0x6dc   :  { %v1268_v38 = vpop.f32.mrf.mxu2  ;;  %1577 = vmatpush.bf16.msra.mxu1 %v2915_v23 }
 0x6dd   :  { %v1324_v40 = vpack.c.bf16 %v1268_v38, %v1266_v16 }
 0x6de   :  { %v1307_v52 = vpop.f32.mrf.mxu3 }
 0x6df   :  { %1505 = vmatmul.bf16.gmra.mxu1 %v1324_v40  ;;  %v1534_v1 = vpack.c.bf16 %v1307_v52, %v1305_v43 }
 0x6e0   :  { %1578 = vmatpush.bf16.msra.mxu1 %v2914_v24 }
 0x6e4   :  { %v1271_v42 = vpop.f32.mrf.mxu2  ;;  %1579 = vmatpush.bf16.msra.mxu1 %v2913_v7 }
 0x6e6   :  { %v1310_v56 = vpop.f32.mrf.mxu3 }
 0x6e8   :  { %1580 = vmatpush.bf16.msra.mxu1 %v2912_v8 }
 0x6ec   :  { %v1273_v44 = vpop.f32.mrf.mxu2  ;;  %1581 = vmatpush.bf16.msra.mxu1 %v2911_v33 }
 0x6ed   :  { %v1322_v51 = vpack.c.bf16 %v1273_v44, %v1271_v42 }
 0x6ee   :  { %v1312_v60 = vpop.f32.mrf.mxu3 }
 0x6ef   :  { %1519 = vmatmul.bf16.vlgmr.msrb.gmra.mxu0 %v1322_v51  ;;  %1544 = vmatmul.bf16.vlgmr.msrb.gmra.mxu1 %v1530_v49  ;;  %v1532_v62 = vpack.c.bf16 %v1312_v60, %v1310_v56 }
 0x6f4   :  { %v1276_v53 = vpop.f32.mrf.mxu2 }
 0x6f6   :  { %v1315_v63 = vpop.f32.mrf.mxu3 }
 0x6fc   :  { %v1278_v54 = vpop.f32.mrf.mxu2 }
 0x6fd   :  { %v1325_v59 = vpack.c.bf16 %v1278_v54, %v1276_v53 }
 0x6fe   :  { %v1317_v0 = vpop.f32.mrf.mxu3 }
 0x6ff   :  { %1524 = vmatmul.bf16.gmra.mxu0 %v1325_v59  ;;  %1549 = vmatmul.bf16.gmra.mxu1 %v1533_v57  ;;  %v1535_v2 = vpack.c.bf16 %v1317_v0, %v1315_v63 }
 0x70f   :  { %1563 = vmatmul.bf16.vlgmr.msra.gmra.mxu0 %v1531_v61  ;;  %1582 = vmatmul.bf16.vlgmr.msra.gmra.mxu1 %v1532_v62 }
 0x71f   :  { %1568 = vmatmul.bf16.gmra.mxu0 %v1534_v1  ;;  %1587 = vmatmul.bf16.gmra.mxu1 %v1535_v2 }
 0x72c   :  { %v1482_v4 = vpop.f32.mrf.mxu0 }
 0x72d   :  { %v1483_v28 = vadd.f32 %v2991_v26, %v1482_v4 }
 0x734   :  { %v1484_v10 = vpop.f32.mrf.mxu0 }
 0x735   :  { %v1485_v24 = vadd.f32 %v2991_v26, %v1484_v10 }
 0x73c   :  { %v1487_v13 = vpop.f32.mrf.mxu0 }
 0x73d   :  { %v1488_v30 = vadd.f32 %v2991_v26, %v1487_v13 }
 0x744   :  { %v1489_v18 = vpop.f32.mrf.mxu0 }
 0x745   :  { %v1490_v38 = vadd.f32 %v2991_v26, %v1489_v18 }
 0x74c   :  { %v1501_v5 = vpop.f32.mrf.mxu1 }
 0x74d   :  { %v1502_v32 = vadd.f32 %v1501_v5, %v1483_v28 }
 0x754   :  { %v1503_v11 = vpop.f32.mrf.mxu1 }
 0x755   :  { %v1504_v7 = vadd.f32 %v1503_v11, %v1485_v24 }
 0x75c   :  { %v1506_v15 = vpop.f32.mrf.mxu1 }
 0x75d   :  { %v1507_v33 = vadd.f32 %v1506_v15, %v1488_v30 }
 0x764   :  { %v1508_v19 = vpop.f32.mrf.mxu1 }
 0x765   :  { %v1509_v41 = vadd.f32 %v1508_v19, %v1490_v38 }
 0x76c   :  { %v1520_v20 = vpop.f32.mrf.mxu0  ;;  %v1545_v21 = vpop.f32.mrf.mxu1 }
 0x76d   :  { %v1521_v16 = vadd.f32 %v1520_v20, %v1502_v32  ;;  %v1546_v18 = vadd.f32 %v2991_v26, %v1545_v21 }
 0x76f   :  { %v1595_v42 = vmax.f32 %v1521_v16, 0.0 }
 0x774   :  { %v1522_v22 = vpop.f32.mrf.mxu0  ;;  %v1547_v23 = vpop.f32.mrf.mxu1 }
 0x775   :  { %v1523_v14 = vadd.f32 %v1522_v22, %v1504_v7  ;;  %v1548_v10 = vadd.f32 %v2991_v26, %v1547_v23 }
 0x777   :  { %v1596_v40 = vmax.f32 %v1523_v14, 0.0 }
 0x779   :  { %v1599_v51 = vadd.f32 %v1596_v40, %v1595_v42 }
 0x77c   :  { %v1525_v8 = vpop.f32.mrf.mxu0  ;;  %v1550_v31 = vpop.f32.mrf.mxu1 }
 0x77d   :  { %v1526_v36 = vadd.f32 %v1525_v8, %v1507_v33  ;;  %v1551_v19 = vadd.f32 %v2991_v26, %v1550_v31 }
 0x77f   :  { %v1597_v43 = vmax.f32 %v1526_v36, 0.0 }
 0x781   :  { %v1600_v53 = vadd.f32 %v1599_v51, %v1597_v43 }
 0x784   :  { %v1527_v44 = vpop.f32.mrf.mxu0  ;;  %v1552_v49 = vpop.f32.mrf.mxu1 }
 0x785   :  { %v1528_v52 = vadd.f32 %v1527_v44, %v1509_v41  ;;  %v1553_v41 = vadd.f32 %v2991_v26, %v1552_v49 }
 0x787   :  { %v1598_v54 = vmax.f32 %v1528_v52, 0.0 }
 0x789   :  { %v1601_v56 = vadd.f32 %v1600_v53, %v1598_v54 }
 0x78b   :  { %v1602_v57 = vrot.slane %v1601_v56, 4 }
 0x78c   :  { %v1564_v59 = vpop.f32.mrf.mxu0  ;;  %v1583_v60 = vpop.f32.mrf.mxu1 }
 0x78d   :  { %v1603_v61 = vadd.f32 %v1602_v57, %v1601_v56  ;;  %v1565_v32 = vadd.f32 %v1564_v59, %v1546_v18 }
 0x78f   :  { %v1604_v62 = vrot.slane %v1603_v61, 2  ;;  %v1584_v36 = vadd.f32 %v1583_v60, %v1565_v32 }
 0x791   :  { %v1605_v63 = vadd.f32 %v1604_v62, %v1603_v61  ;;  %v1656_v51 = vmax.f32 %v1584_v36, 0.0 }
 0x793   :  { %v1606_v0 = vrot.slane %v1605_v63, 1 }
 0x794   :  { %v1566_v1 = vpop.f32.mrf.mxu0  ;;  %v1585_v2 = vpop.f32.mrf.mxu1 }
 0x795   :  { %v1607_v4 = vadd.f32 %v1606_v0, %v1605_v63  ;;  %v1567_v28 = vadd.f32 %v1566_v1, %v1548_v10 }
 0x797   :  { %v1608_v5 = vmul.f32 %v1607_v4, %v3432_v39  ;;  %v1586_v14 = vadd.f32 %v1585_v2, %v1567_v28 }
 0x799   :  { %v3695_v11 = vsub.f32 %v1595_v42, %v1608_v5  ;;  %v3697_v13 = vsub.f32 %v1596_v40, %v1608_v5  ;;  %v3699_v15 = vsub.f32 %v1597_v43, %v1608_v5  ;;  %v3701_v20 = vsub.f32 %v1598_v54, %v1608_v5 }
 0x79a   :  { %v1657_v42 = vmax.f32 %v1586_v14, 0.0  ;;  %v2992_v14 = vld [vmem:[%s3904_s17] ss:$0 sm:$0xff] }
 0x79b   :  { %v1613_v22 = vmul.f32 %v3695_v11, %v3695_v11  ;;  %v1614_v24 = vmul.f32 %v3697_v13, %v3697_v13  ;;  %v1615_v23 = vmul.f32 %v3699_v15, %v3699_v15  ;;  %v1616_v21 = vmul.f32 %v3701_v20, %v3701_v20 }
 0x79c   :  { %v1569_v30 = vpop.f32.mrf.mxu0  ;;  %v1588_v7 = vpop.f32.mrf.mxu1  ;;  %v1660_v57 = vadd.f32 %v1657_v42, %v1656_v51 }
 0x79d   :  { %v1617_v8 = vadd.f32 %v1614_v24, %v1613_v22  ;;  %v1570_v33 = vadd.f32 %v1569_v30, %v1551_v19 }
 0x79f   :  { %v1618_v31 = vadd.f32 %v1617_v8, %v1615_v23  ;;  %v1589_v38 = vadd.f32 %v1588_v7, %v1570_v33 }
 0x7a1   :  { %v1619_v16 = vadd.f32 %v1618_v31, %v1616_v21  ;;  %v1658_v52 = vmax.f32 %v1589_v38, 0.0 }
 0x7a3   :  { %v1620_v40 = vrot.slane %v1619_v16, 4  ;;  %v1661_v62 = vadd.f32 %v1660_v57, %v1658_v52 }
 0x7a4   :  { %v1571_v43 = vpop.f32.mrf.mxu0  ;;  %v1590_v54 = vpop.f32.mrf.mxu1 }
 0x7a5   :  { %v1621_v44 = vadd.f32 %v1620_v40, %v1619_v16  ;;  %v1572_v53 = vadd.f32 %v1571_v43, %v1553_v41 }
 0x7a7   :  { %v1622_v56 = vrot.slane %v1621_v44, 2  ;;  %v1591_v59 = vadd.f32 %v1590_v54, %v1572_v53  ;;  %v1630_v53 = vmul.f32 %v2992_v14, %v3695_v11 }
 0x7a9   :  { %v1623_v61 = vadd.f32 %v1622_v56, %v1621_v44  ;;  %v1659_v63 = vmax.f32 %v1591_v59, 0.0  ;;  %v2993_v44 = vld [vmem:[%s3905_s18] ss:$0 sm:$0xff]  ;;  %v1631_v56 = vmul.f32 %v2992_v14, %v3697_v13 }
 0x7ab   :  { %v1624_v0 = vrot.slane %v1623_v61, 1  ;;  %v1662_v1 = vadd.f32 %v1661_v62, %v1659_v63 }
 0x7ad   :  { %v1625_v2 = vadd.f32 %v1624_v0, %v1623_v61  ;;  %v1663_v60 = vrot.slane %v1662_v1, 4 }
 0x7af   :  { %v1626_v4 = vmul.f32 %v1625_v2, %v3432_v39  ;;  %v1664_v26 = vadd.f32 %v1663_v60, %v1662_v1 }
 0x7b1   :  { %v1634_v49 = vadd.f32 1e-05, %v1626_v4  ;;  %v1665_v5 = vrot.slane %v1664_v26, 2 }
 0x7b3   :  { %3009 = vrsqrt.f32 %v1634_v49  ;;  %v1666_v10 = vadd.f32 %v1665_v5, %v1664_v26  ;;  %vm1641_vm4 = vweird.f32 %v1634_v49 }
 0x7b5   :  { %v1667_v18 = vrot.slane %v1666_v10, 1 }
 0x7b7   :  { %v1668_v19 = vadd.f32 %v1667_v18, %v1666_v10 }
 0x7b9   :  { %v3010_v22 = vpop.eup %3009  ;;  %v1669_v24 = vmul.f32 %v1668_v19, %v3432_v39 }
 0x7ba   :  { %v1636_v28 = vmul.f32 %v3010_v22, %v1634_v49  ;;  %vm1642_vm3 = vweird.f32 %v3010_v22 }
 0x7bb   :  { %v1670_v30 = vsub.f32 %v1656_v51, %v1669_v24  ;;  %v1671_v7 = vsub.f32 %v1657_v42, %v1669_v24  ;;  %v1672_v23 = vsub.f32 %v1658_v52, %v1669_v24  ;;  %v1673_v32 = vsub.f32 %v1659_v63, %v1669_v24  ;;  %vm1643_vm5 = vmor %vm1641_vm4, %vm1642_vm3 }
 0x7bc   :  { %v1637_v8 = vmul.f32 %v3010_v22, %v1636_v28  ;;  %v1633_v42 = vmul.f32 %v2992_v14, %v3701_v20  ;;  %v1632_v52 = vmul.f32 %v2992_v14, %v3699_v15 }
 0x7bd   :  { %v1674_v33 = vmul.f32 %v1670_v30, %v1670_v30  ;;  %v1675_v21 = vmul.f32 %v1671_v7, %v1671_v7  ;;  %v1676_v16 = vmul.f32 %v1672_v23, %v1672_v23  ;;  %v1677_v40 = vmul.f32 %v1673_v32, %v1673_v32 }
 0x7be   :  { %v1638_v31 = vmul.f32 0.5, %v1637_v8 }
 0x7bf   :  { %v1678_v36 = vadd.f32 %v1675_v21, %v1674_v33  ;;  %v1691_v33 = vmul.f32 %v2992_v14, %v1673_v32  ;;  %v1690_v21 = vmul.f32 %v2992_v14, %v1672_v23  ;;  %v2923_v23 = vld [vmem:[#allocation7 + $0x20] sm:$0xff]  ;;  %v2920_v32 = vld [vmem:[#allocation7 + $0x8] sm:$0xff] }
 0x7c0   :  { %v1639_v38 = vsub.f32 1.5, %v1638_v31  ;;  %v1689_v31 = vmul.f32 %v2992_v14, %v1671_v7  ;;  %v2924_v7 = vld [vmem:[#allocation7 + $0x28] sm:$0xff] }
 0x7c1   :  { %v1679_v41 = vadd.f32 %v1678_v36, %v1676_v16 }
 0x7c2   :  { %v1640_v43 = vmul.f32 %v3010_v22, %v1639_v38 }
 0x7c3   :  { %v1680_v51 = vadd.f32 %v1679_v41, %v1677_v40 }
 0x7c4   :  { %v1644_v54 = vsel %vm1643_vm5, %v3010_v22, %v1640_v43 }
 0x7c5   :  { %v1648_v57 = vmul.f32 %v1644_v54, %v1633_v42  ;;  %v1681_v59 = vrot.slane %v1680_v51, 4  ;;  %v1647_v61 = vmul.f32 %v1644_v54, %v1632_v52  ;;  %v1645_v62 = vmul.f32 %v1644_v54, %v1630_v53 }
 0x7c6   :  { %v1646_v63 = vmul.f32 %v1644_v54, %v1631_v56  ;;  %v3751_v56 = vld [vmem:[#allocation7 + $0x68] sm:$0xff] }
 0x7c7   :  { %v1655_v0 = vadd.f32 %v2993_v44, %v1648_v57  ;;  %v1682_v20 = vadd.f32 %v1681_v59, %v1680_v51  ;;  %v1654_v1 = vadd.f32 %v2993_v44, %v1647_v61  ;;  %v1652_v4 = vadd.f32 %v2993_v44, %v1645_v62  ;;  %v3757_v57 = vld [vmem:[#allocation7 + $0x58] sm:$0xff]  ;;  %v3760_v61 = vld [vmem:[#allocation7 + $0x50] sm:$0xff] }
 0x7c8   :  { %v1653_v26 = vadd.f32 %v2993_v44, %v1646_v63  ;;  %v3766_v63 = vld [vmem:[#allocation7 + $0x40] sm:$0xff] }
 0x7c9   :  { %v1683_v2 = vrot.slane %v1682_v20, 2  ;;  %v1762_v60 = vpack.c.bf16 %v1655_v0, %v1654_v1 }
 0x7ca   :  { %v1760_v5 = vpack.c.bf16 %v1653_v26, %v1652_v4  ;;  %v2939_v26 = vld [vmem:[#allocation7 + $0xa0] sm:$0xff] }
 0x7cb   :  { %v1684_v49 = vadd.f32 %v1683_v2, %v1682_v20  ;;  %1770 = vmatpush.bf16.msra.mxu2 %v1762_v60  ;;  %v2942_v20 = vld [vmem:[#allocation7 + $0xb8] sm:$0xff]  ;;  %v2941_v2 = vld [vmem:[#allocation7 + $0xb0] sm:$0xff]  ;;  %v2940_v60 = vld [vmem:[#allocation7 + $0xa8] sm:$0xff] }
 0x7cd   :  { %v1685_v15 = vrot.slane %v1684_v49, 1 }
 0x7cf   :  { %v1686_v11 = vadd.f32 %v1685_v15, %v1684_v49  ;;  %1771 = vmatpush.bf16.msra.mxu2 %v1760_v5  ;;  %v2938_v15 = vld [vmem:[#allocation7 + $0x98] sm:$0xff] }
 0x7d1   :  { %v1687_v13 = vmul.f32 %v1686_v11, %v3432_v39  ;;  %v1688_v39 = vmul.f32 %v2992_v14, %v1670_v30  ;;  %v2926_v30 = vld [vmem:[#allocation7 + $0x38] sm:$0xff]  ;;  %v2919_v14 = vld [vmem:[#allocation7] sm:$0xff]  ;;  %v2937_v11 = vld [vmem:[#allocation7 + $0x90] sm:$0xff] }
 0x7d2   :  { %2733 = vmatmul.msk.bf16.vlgmr.msra.gmra.mxu2 %vm163_vm0, %v3637_v45  ;;  %1995 = vmatpush.bf16.msrb.mxu0 %v2926_v30 }
 0x7d3   :  { %v1692_v10 = vadd.f32 1e-05, %v1687_v13  ;;  %2943 = vmatpush.bf16.msrb.mxu2 %v2942_v20 }
 0x7d5   :  { %3011 = vrsqrt.f32 %v1692_v10  ;;  %vm1699_vm7 = vweird.f32 %v1692_v10 }
 0x7d7   :  { %2944 = vmatpush.bf16.msrb.mxu2 %v2941_v2 }
 0x7db   :  { %v3012_v18 = vpop.eup %3011  ;;  %2945 = vmatpush.bf16.msrb.mxu2 %v2940_v60 }
 0x7dc   :  { %v1694_v19 = vmul.f32 %v3012_v18, %v1692_v10  ;;  %vm1700_vm6 = vweird.f32 %v3012_v18  ;;  %v2936_v10 = vld [vmem:[#allocation7 + $0x88] sm:$0xff] }
 0x7dd   :  { %vm1701_vm8 = vmor %vm1699_vm7, %vm1700_vm6 }
 0x7de   :  { %v1695_v22 = vmul.f32 %v3012_v18, %v1694_v19  ;;  %v2935_v19 = vld [vmem:[#allocation7 + $0x80] sm:$0xff] }
 0x7df   :  { %2946 = vmatpush.bf16.msrb.mxu2 %v2939_v26 }
 0x7e0   :  { %v1696_v24 = vmul.f32 0.5, %v1695_v22 }
 0x7e2   :  { %v1697_v28 = vsub.f32 1.5, %v1696_v24  ;;  %2734 = vmatmul.msk.bf16.gmra.mxu2 %vm163_vm0, %v3646_v46 }
 0x7e3   :  { %2947 = vmatpush.bf16.msrb.mxu2 %v2938_v15 }
 0x7e4   :  { %v1698_v8 = vmul.f32 %v3012_v18, %v1697_v28 }
 0x7e6   :  { %v1702_v16 = vsel %vm1701_vm8, %v3012_v18, %v1698_v8 }
 0x7e7   :  { %v1706_v36 = vmul.f32 %v1702_v16, %v1691_v33  ;;  %v1705_v38 = vmul.f32 %v1702_v16, %v1690_v21  ;;  %v1703_v40 = vmul.f32 %v1702_v16, %v1688_v39  ;;  %v1704_v41 = vmul.f32 %v1702_v16, %v1689_v31  ;;  %2948 = vmatpush.bf16.msrb.mxu2 %v2937_v11 }
 0x7e9   :  { %v1710_v43 = vadd.f32 %v2993_v44, %v1706_v36  ;;  %v1709_v42 = vadd.f32 %v2993_v44, %v1705_v38  ;;  %v1707_v52 = vadd.f32 %v2993_v44, %v1703_v40  ;;  %v1708_v53 = vadd.f32 %v2993_v44, %v1704_v41  ;;  %v3746_v44 = vld [vmem:[#allocation7 + $0x78] sm:$0xff] }
 0x7ea   :  { %2014 = vmatpush.bf16.msrb.mxu1 %v3746_v44 }
 0x7eb   :  { %v1763_v51 = vpack.c.bf16 %v1710_v43, %v1709_v42  ;;  %v1761_v54 = vpack.c.bf16 %v1708_v53, %v1707_v52  ;;  %2949 = vmatpush.bf16.msrb.mxu2 %v2936_v10 }
 0x7ed   :  { %1809 = vmatpush.bf16.msra.mxu3 %v1763_v51 }
 0x7ef   :  { %2950 = vmatpush.bf16.msrb.mxu2 %v2935_v19 }
 0x7f1   :  { %1810 = vmatpush.bf16.msra.mxu3 %v1761_v54 }
 0x7f2   :  { %2735 = vmatmul.msk.bf16.gmra.mxu2 %vm163_vm0, %v3655_v47 }
 0x7f4   :  { %2739 = vmatmul.msk.bf16.vlgmr.msra.gmra.mxu3 %vm163_vm0, %v3637_v45  ;;  %v2925_v45 = vld [vmem:[#allocation7 + $0x30] sm:$0xff] }
 0x7f5   :  { %1996 = vmatpush.bf16.msrb.mxu0 %v2925_v45 }
 0x7f9   :  { %1997 = vmatpush.bf16.msrb.mxu0 %v2924_v7 }
 0x7fd   :  { %1998 = vmatpush.bf16.msrb.mxu0 %v2923_v23 }
 0x802   :  { %2736 = vmatmul.msk.bf16.gmra.mxu2 %vm163_vm0, %v3664_v48 }
 0x804   :  { %2740 = vmatmul.msk.bf16.gmra.mxu3 %vm163_vm0, %v3646_v46  ;;  %v2922_v46 = vld [vmem:[#allocation7 + $0x18] sm:$0xff] }
 0x805   :  { %1999 = vmatpush.bf16.msrb.mxu0 %v2922_v46 }
 0x812   :  { %2737 = vmatmul.msk.bf16.gmra.mxu2 %vm163_vm0, %v3673_v50 }
 0x814   :  { %2741 = vmatmul.msk.bf16.gmra.mxu3 %vm163_vm0, %v3655_v47  ;;  %v2921_v47 = vld [vmem:[#allocation7 + $0x10] sm:$0xff] }
 0x815   :  { %2000 = vmatpush.bf16.msrb.mxu0 %v2921_v47 }
 0x819   :  { %2001 = vmatpush.bf16.msrb.mxu0 %v2920_v32 }
 0x81d   :  { %2002 = vmatpush.bf16.msrb.mxu0 %v2919_v14 }
 0x821   :  { %2033 = vmatpush.bf16.msra.mxu0 %v2942_v20 }
 0x822   :  { %2738 = vmatmul.msk.bf16.gmra.mxu2 %vm163_vm0, %v3682_v55 }
 0x824   :  { %2742 = vmatmul.msk.bf16.gmra.mxu3 %vm163_vm0, %v3664_v48  ;;  %v2933_v48 = vld [vmem:[#allocation7 + $0x70] sm:$0xff] }
 0x825   :  { %2015 = vmatpush.bf16.msrb.mxu1 %v2933_v48  ;;  %2034 = vmatpush.bf16.msra.mxu0 %v2941_v2 }
 0x829   :  { %2016 = vmatpush.bf16.msrb.mxu1 %v3751_v56  ;;  %2035 = vmatpush.bf16.msra.mxu0 %v2940_v60 }
 0x82d   :  { %2036 = vmatpush.bf16.msra.mxu0 %v2939_v26 }
 0x831   :  { %2037 = vmatpush.bf16.msra.mxu0 %v2938_v15 }
 0x834   :  { %2743 = vmatmul.msk.bf16.gmra.mxu3 %vm163_vm0, %v3673_v50  ;;  %v3754_v50 = vld [vmem:[#allocation7 + $0x60] sm:$0xff] }
 0x835   :  { %2017 = vmatpush.bf16.msrb.mxu1 %v3754_v50  ;;  %2038 = vmatpush.bf16.msra.mxu0 %v2937_v11 }
 0x839   :  { %2018 = vmatpush.bf16.msrb.mxu1 %v3757_v57  ;;  %2039 = vmatpush.bf16.msra.mxu0 %v2936_v10 }
 0x83d   :  { %2019 = vmatpush.bf16.msrb.mxu1 %v3760_v61  ;;  %2040 = vmatpush.bf16.msra.mxu0 %v2935_v19 }
 0x844   :  { %2744 = vmatmul.msk.bf16.gmra.mxu3 %vm163_vm0, %v3682_v55  ;;  %v3763_v55 = vld [vmem:[#allocation7 + $0x48] sm:$0xff] }
 0x845   :  { %2020 = vmatpush.bf16.msrb.mxu1 %v3763_v55 }
 0x849   :  { %2021 = vmatpush.bf16.msrb.mxu1 %v3766_v63 }
 0x84d   :  { %2058 = vmatpush.bf16.msra.mxu1 %v2926_v30 }
 0x851   :  { %2059 = vmatpush.bf16.msra.mxu1 %v2925_v45 }
 0x855   :  { %v1773_v59 = vpop.f32.mrf.mxu2  ;;  %2060 = vmatpush.bf16.msra.mxu1 %v2924_v7 }
 0x859   :  { %2061 = vmatpush.bf16.msra.mxu1 %v2923_v23 }
 0x85d   :  { %v1775_v62 = vpop.f32.mrf.mxu2  ;;  %2062 = vmatpush.bf16.msra.mxu1 %v2922_v46 }
 0x85e   :  { %v1842_v0 = vpack.c.bf16 %v1775_v62, %v1773_v59 }
 0x860   :  { %2003 = vmatmul.bf16.vlgmr.msrb.gmra.mxu0 %v1842_v0 }
 0x861   :  { %2063 = vmatpush.bf16.msra.mxu1 %v2921_v47  ;;  %2077 = vmatpush.bf16.msrb.mxu0 %v3746_v44 }
 0x865   :  { %v1778_v1 = vpop.f32.mrf.mxu2  ;;  %2064 = vmatpush.bf16.msra.mxu1 %v2920_v32  ;;  %2078 = vmatpush.bf16.msrb.mxu0 %v2933_v48 }
 0x869   :  { %2065 = vmatpush.bf16.msra.mxu1 %v2919_v14  ;;  %2079 = vmatpush.bf16.msrb.mxu0 %v3751_v56 }
 0x86d   :  { %v1780_v4 = vpop.f32.mrf.mxu2  ;;  %2080 = vmatpush.bf16.msrb.mxu0 %v3754_v50  ;;  %v2994_v50 = vld [vmem:[%s3903_s16] ss:$0 sm:$0xff] }
 0x86e   :  { %v1845_v49 = vpack.c.bf16 %v1780_v4, %v1778_v1 }
 0x870   :  { %2008 = vmatmul.bf16.gmra.mxu0 %v1845_v49 }
 0x871   :  { %2081 = vmatpush.bf16.msrb.mxu0 %v3757_v57 }
 0x875   :  { %v1783_v5 = vpop.f32.mrf.mxu2  ;;  %2082 = vmatpush.bf16.msrb.mxu0 %v3760_v61 }
 0x877   :  { %v1812_v13 = vpop.f32.mrf.mxu3 }
 0x879   :  { %2083 = vmatpush.bf16.msrb.mxu0 %v3763_v55 }
 0x87d   :  { %v1785_v18 = vpop.f32.mrf.mxu2  ;;  %2084 = vmatpush.bf16.msrb.mxu0 %v3766_v63 }
 0x87e   :  { %v1843_v22 = vpack.c.bf16 %v1785_v18, %v1783_v5 }
 0x87f   :  { %v1814_v24 = vpop.f32.mrf.mxu3 }
 0x880   :  { %2022 = vmatmul.bf16.vlgmr.msrb.gmra.mxu1 %v1843_v22  ;;  %v2052_v38 = vpack.c.bf16 %v1814_v24, %v1812_v13 }
 0x881   :  { %2096 = vmatpush.bf16.msrb.mxu1 %v2942_v20 }
 0x885   :  { %v1788_v28 = vpop.f32.mrf.mxu2  ;;  %2097 = vmatpush.bf16.msrb.mxu1 %v2941_v2 }
 0x887   :  { %v1817_v8 = vpop.f32.mrf.mxu3 }
 0x889   :  { %2098 = vmatpush.bf16.msrb.mxu1 %v2940_v60  ;;  %v3782_v60 = vld [vmem:[%s3918_s26 + $0x8] sm:$0xff] }
 0x88d   :  { %v1790_v33 = vpop.f32.mrf.mxu2  ;;  %2099 = vmatpush.bf16.msrb.mxu1 %v2939_v26  ;;  %v2213_v26 = vmul.f32 %v3782_v60, %v3782_v60 }
 0x88e   :  { %v1846_v21 = vpack.c.bf16 %v1790_v33, %v1788_v28 }
 0x88f   :  { %v1819_v39 = vpop.f32.mrf.mxu3  ;;  %2218 = vadd.xlane.f32.xlu1 %v2213_v26 }
 0x890   :  { %2027 = vmatmul.bf16.gmra.mxu1 %v1846_v21  ;;  %v2055_v52 = vpack.c.bf16 %v1819_v39, %v1817_v8 }
 0x891   :  { %2100 = vmatpush.bf16.msrb.mxu1 %v2938_v15 }
 0x895   :  { %v1793_v31 = vpop.f32.mrf.mxu2  ;;  %2101 = vmatpush.bf16.msrb.mxu1 %v2937_v11 }
 0x897   :  { %v1822_v16 = vpop.f32.mrf.mxu3 }
 0x899   :  { %2102 = vmatpush.bf16.msrb.mxu1 %v2936_v10 }
 0x89d   :  { %v1795_v36 = vpop.f32.mrf.mxu2  ;;  %2103 = vmatpush.bf16.msrb.mxu1 %v2935_v19 }
 0x89e   :  { %v1844_v40 = vpack.c.bf16 %v1795_v36, %v1793_v31 }
 0x89f   :  { %v1824_v41 = vpop.f32.mrf.mxu3 }
 0x8a0   :  { %2041 = vmatmul.bf16.vlgmr.msra.gmra.mxu0 %v1844_v40  ;;  %2066 = vmatmul.bf16.vlgmr.msra.gmra.mxu1 %v2052_v38  ;;  %v2053_v45 = vpack.c.bf16 %v1824_v41, %v1822_v16 }
 0x8a5   :  { %v1798_v43 = vpop.f32.mrf.mxu2 }
 0x8a7   :  { %v1827_v42 = vpop.f32.mrf.mxu3 }
 0x8ad   :  { %v1800_v51 = vpop.f32.mrf.mxu2 }
 0x8ae   :  { %v1847_v53 = vpack.c.bf16 %v1800_v51, %v1798_v43 }
 0x8af   :  { %v1829_v54 = vpop.f32.mrf.mxu3 }
 0x8b0   :  { %2046 = vmatmul.bf16.gmra.mxu0 %v1847_v53  ;;  %2071 = vmatmul.bf16.gmra.mxu1 %v2055_v52  ;;  %v2056_v47 = vpack.c.bf16 %v1829_v54, %v1827_v42 }
 0x8b7   :  { %v1832_v30 = vpop.f32.mrf.mxu3 }
 0x8bf   :  { %v1834_v7 = vpop.f32.mrf.mxu3 }
 0x8c0   :  { %v2054_v23 = vpack.c.bf16 %v1834_v7, %v1832_v30  ;;  %2085 = vmatmul.bf16.vlgmr.msrb.gmra.mxu0 %v2053_v45 }
 0x8c2   :  { %2104 = vmatmul.bf16.vlgmr.msrb.gmra.mxu1 %v2054_v23 }
 0x8c7   :  { %v1837_v46 = vpop.f32.mrf.mxu3 }
 0x8cf   :  { %v1839_v32 = vpop.f32.mrf.mxu3 }
 0x8d0   :  { %v2057_v14 = vpack.c.bf16 %v1839_v32, %v1837_v46  ;;  %2090 = vmatmul.bf16.gmra.mxu0 %v2056_v47 }
 0x8d2   :  { %2109 = vmatmul.bf16.vlgmr.msrb.gmra.mxu2 %v2057_v14 }
 0x8dd   :  { %v2004_v44 = vpop.f32.mrf.mxu0 }
 0x8de   :  { %v2005_v49 = vadd.f32 %v2994_v50, %v2004_v44 }
 0x8e5   :  { %v2006_v56 = vpop.f32.mrf.mxu0 }
 0x8e6   :  { %v2007_v57 = vadd.f32 %v2994_v50, %v2006_v56 }
 0x8ed   :  { %v2009_v55 = vpop.f32.mrf.mxu0 }
 0x8ee   :  { %v2010_v62 = vadd.f32 %v2994_v50, %v2009_v55 }
 0x8f5   :  { %v2011_v20 = vpop.f32.mrf.mxu0 }
 0x8f6   :  { %v2012_v1 = vadd.f32 %v2994_v50, %v2011_v20  ;;  %v1153_v20 = vsub.f32 %v3619_v34, %v3542_v12 }
 0x8fd   :  { %v2023_v48 = vpop.f32.mrf.mxu1 }
 0x8fe   :  { %v2024_v15 = vadd.f32 %v2023_v48, %v2005_v49  ;;  %v3806_v48 = vld [vmem:[%s3918_s26 + $0x18] sm:$0xff] }
 0x905   :  { %v2025_v59 = vpop.f32.mrf.mxu1 }
 0x906   :  { %v2026_v61 = vadd.f32 %v2025_v59, %v2007_v57  ;;  %v2215_v57 = vmul.f32 %v3806_v48, %v3806_v48 }
 0x90d   :  { %v2028_v63 = vpop.f32.mrf.mxu1 }
 0x90e   :  { %v2029_v0 = vadd.f32 %v2028_v63, %v2010_v62  ;;  %v1151_v62 = vsub.f32 %v3612_v6, %v3534_v58 }
 0x915   :  { %v2030_v2 = vpop.f32.mrf.mxu1 }
 0x916   :  { %v2031_v4 = vadd.f32 %v2030_v2, %v2012_v1  ;;  %v1157_v1 = vmul.f32 %v1153_v20, %v1153_v20 }
 0x91d   :  { %v2042_v5 = vpop.f32.mrf.mxu0  ;;  %v2067_v11 = vpop.f32.mrf.mxu1 }
 0x91e   :  { %v2043_v13 = vadd.f32 %v2042_v5, %v2024_v15  ;;  %v2068_v31 = vadd.f32 %v2994_v50, %v2067_v11 }
 0x920   :  { %v2119_v10 = vsub.f32 %v2043_v13, %v3602_v25 }
 0x922   :  { %v2123_v18 = vmul.f32 %v2119_v10, %v2119_v10 }
 0x924   :  { %2127 = vadd.xlane.f32.xlu0 %v2123_v18 }
 0x925   :  { %v2044_v19 = vpop.f32.mrf.mxu0  ;;  %v2069_v22 = vpop.f32.mrf.mxu1 }
 0x926   :  { %v2070_v41 = vadd.f32 %v2994_v50, %v2069_v22  ;;  %v2045_v59 = vadd.f32 %v2044_v19, %v2026_v61  ;;  %v2217_v61 = vpop.xlane.xlu0 %2216 }
 0x927   :  { %v2224_v2 = vmax.f32 %v2217_v61, 1e-24 }
 0x929   :  { %3013 = vrsqrt.f32 %v2224_v2  ;;  %vm2234_vm0 = vweird.f32 %v2224_v2 }
 0x92d   :  { %v2047_v24 = vpop.f32.mrf.mxu0  ;;  %v2072_v28 = vpop.f32.mrf.mxu1 }
 0x92e   :  { %v3787_v8 = vadd.f32 %v2047_v24, %v2029_v0  ;;  %v2073_v30 = vadd.f32 %v2994_v50, %v2072_v28  ;;  %v1155_v0 = vmul.f32 %v1151_v62, %v1151_v62  ;;  %v2221_v10 = vpop.xlane.xlu0 %2220 }
 0x92f   :  { %v3014_v26 = vpop.eup %3013  ;;  %v3819_v18 = vmax.f32 %v2221_v10, 1e-24 }
 0x930   :  { %v2229_v15 = vmul.f32 %v3014_v26, %v2224_v2  ;;  %vm2235_vm9 = vweird.f32 %v3014_v26 }
 0x931   :  { %vm2236_vm10 = vmor %vm2234_vm0, %vm2235_vm9  ;;  %vm2254_vm5 = vweird.f32 %v3819_v18 }
 0x932   :  { %v2230_v5 = vmul.f32 %v3014_v26, %v2229_v15 }
 0x934   :  { %v2231_v13 = vmul.f32 0.5, %v2230_v5 }
 0x935   :  { %v2049_v33 = vpop.f32.mrf.mxu0  ;;  %v2074_v39 = vpop.f32.mrf.mxu1 }
 0x936   :  { %v3789_v21 = vadd.f32 %v2049_v33, %v2031_v4  ;;  %v2075_v32 = vadd.f32 %v2994_v50, %v2074_v39  ;;  %v2120_v50 = vsub.f32 %v2045_v59, %v3782_v60  ;;  %v2219_v4 = vpop.xlane.xlu1 %2218  ;;  %v2232_v34 = vsub.f32 1.5, %v2231_v13 }
 0x937   :  { %v2225_v49 = vmax.f32 %v2219_v4, 1e-24 }
 0x938   :  { %v2124_v63 = vmul.f32 %v2120_v50, %v2120_v50 }
 0x939   :  { %3015 = vrsqrt.f32 %v2225_v49  ;;  %vm2244_vm14 = vweird.f32 %v2225_v49 }
 0x93d   :  { %v2086_v16 = vpop.f32.mrf.mxu0 }
 0x93e   :  { %v2087_v36 = vadd.f32 %v2086_v16, %v2068_v31  ;;  %v2233_v31 = vmul.f32 %v3014_v26, %v2232_v34 }
 0x93f   :  { %v2105_v38 = vpop.f32.mrf.mxu1  ;;  %v3016_v6 = vpop.eup %3015 }
 0x940   :  { %v3791_v40 = vadd.f32 %v2105_v38, %v2087_v36  ;;  %v2239_v12 = vmul.f32 %v3016_v6, %v2225_v49  ;;  %vm2245_vm15 = vweird.f32 %v3016_v6 }
 0x941   :  { %vm3830_vm1 = vmor %vm2244_vm14, %vm2245_vm15 }
 0x942   :  { %v2152_v25 = vmul.f32 %v3791_v40, %v3791_v40  ;;  %v2240_v28 = vmul.f32 %v3016_v6, %v2239_v12 }
 0x944   :  { %2156 = vadd.xlane.f32.xlu1 %v2152_v25  ;;  %v2241_v16 = vmul.f32 0.5, %v2240_v28 }
 0x945   :  { %v2088_v43 = vpop.f32.mrf.mxu0 }
 0x946   :  { %v2089_v42 = vadd.f32 %v2088_v43, %v2070_v41  ;;  %v2237_v41 = vsel %vm2236_vm10, %v3014_v26, %v2233_v31 }
 0x947   :  { %v2107_v51 = vpop.f32.mrf.mxu1 }
 0x948   :  { %v3795_v52 = vadd.f32 %v2107_v51, %v2089_v42  ;;  %v2242_v42 = vsub.f32 1.5, %v2241_v16  ;;  %v3042_v16 = vld [vmem:[%s3918_s26 + $0x10] sm:$0xff] }
 0x94a   :  { %v2153_v53 = vmul.f32 %v3795_v52, %v3795_v52 }
 0x94c   :  { %2158 = vadd.xlane.f32.xlu2 %v2153_v53 }
 0x94d   :  { %v2091_v54 = vpop.f32.mrf.mxu0 }
 0x94e   :  { %v2092_v45 = vadd.f32 %v2091_v54, %v2073_v30  ;;  %v3041_v30 = vld [vmem:[%s3918_s26] sm:$0xff]  ;;  %s3178_s26 = smov [#allocation8]  }
 0x94f   :  { %s2351_s13 = sshll.u32 %s3178_s26, 4  ;;  %s2352_s13 = int_to_ptr.vmem [resolvable:$true] %s2351_s13 }
 0x950   :  { %2359 = dma.vmem_to_hbm [thread:$0]  %s2352_s13, 512, %s2354_s8, [#allocation4], %s3179_s7, %s3179_s7, %s3180_s25  }
 0x955   :  { %v2110_v7 = vpop.f32.mrf.mxu2  ;;  %v2093_v47 = vpop.f32.mrf.mxu0 }
 0x956   :  { %v3799_v23 = vadd.f32 %v2110_v7, %v2092_v45  ;;  %v2094_v14 = vadd.f32 %v2093_v47, %v2075_v32  ;;  %v2268_v45 = vmul.f32 %v3041_v30, %v2237_v41 }
 0x958   :  { %v2154_v46 = vmul.f32 %v3799_v23, %v3799_v23 }
 0x95a   :  { %2160 = vadd.xlane.f32.xlu2 %v2154_v46 }
 0x95d   :  { %v2112_v44 = vpop.f32.mrf.mxu2 }
 0x95e   :  { %v3808_v56 = vadd.f32 %v2112_v44, %v2094_v14  ;;  %v2243_v44 = vmul.f32 %v3016_v6, %v2242_v42 }
 0x960   :  { %v2155_v55 = vmul.f32 %v3808_v56, %v3808_v56 }
 0x962   :  { %2162 = vadd.xlane.f32.xlu1 %v2155_v55  ;;  %2222 = vadd.xlane.f32.xlu2 %v2215_v57 }
 0x96a   :  { %2129 = vadd.xlane.f32.xlu1 %v2124_v63  ;;  %1159 = vadd.xlane.f32.xlu2 %v1155_v0  ;;  %v1154_v0 = vsub.f32 %v3628_v3, %v3546_v17 }
 0x972   :  { %1163 = vadd.xlane.f32.xlu2 %v1157_v1 }
 0x9b7   :  { %v2157_v11 = vpop.xlane.xlu1 %2156 }
 0x9b8   :  { %v2164_v58 = vmax.f32 %v2157_v11, 1e-24 }
 0x9ba   :  { %3017 = vrsqrt.f32 %v2164_v58  ;;  %vm2174_vm12 = vweird.f32 %v2164_v58 }
 0x9bb   :  { %3019 = vrsqrt.f32 %v3819_v18 }
 0x9bf   :  { %v2159_v19 = vpop.xlane.xlu2 %2158 }
 0x9c0   :  { %v3018_v22 = vpop.eup %3017  ;;  %v2165_v24 = vmax.f32 %v2159_v19, 1e-24 }
 0x9c1   :  { %v2169_v33 = vmul.f32 %v3018_v22, %v2164_v58  ;;  %v3822_v38 = vpop.eup %3019  ;;  %vm2175_vm11 = vweird.f32 %v3018_v22  ;;  %v1158_v58 = vmul.f32 %v1154_v0, %v1154_v0 }
 0x9c2   :  { %3021 = vrsqrt.f32 %v2165_v24  ;;  %v2249_v54 = vmul.f32 %v3822_v38, %v3819_v18  ;;  %vm2176_vm13 = vmor %vm2174_vm12, %vm2175_vm11  ;;  %vm2184_vm3 = vweird.f32 %v2165_v24  ;;  %vm2255_vm6 = vweird.f32 %v3822_v38 }
 0x9c3   :  { %v2170_v39 = vmul.f32 %v3018_v22, %v2169_v33  ;;  %vm3844_vm7 = vmor %vm2254_vm5, %vm2255_vm6 }
 0x9c4   :  { %v2250_v50 = vmul.f32 %v3822_v38, %v2249_v54 }
 0x9c5   :  { %v2171_v36 = vmul.f32 0.5, %v2170_v39 }
 0x9c6   :  { %v2251_v20 = vmul.f32 0.5, %v2250_v50 }
 0x9c7   :  { %v2172_v25 = vsub.f32 1.5, %v2171_v36 }
 0x9c8   :  { %v3022_v43 = vpop.eup %3021  ;;  %v2252_v13 = vsub.f32 1.5, %v2251_v20 }
 0x9c9   :  { %v2179_v51 = vmul.f32 %v3022_v43, %v2165_v24  ;;  %v2173_v53 = vmul.f32 %v3018_v22, %v2172_v25  ;;  %vm2185_vm2 = vweird.f32 %v3022_v43 }
 0x9ca   :  { %vm2186_vm4 = vmor %vm2184_vm3, %vm2185_vm2 }
 0x9cb   :  { %v2180_v7 = vmul.f32 %v3022_v43, %v2179_v51  ;;  %v2177_v46 = vsel %vm2176_vm13, %v3018_v22, %v2173_v53  ;;  %v2121_v53 = vsub.f32 %v3787_v8, %v3042_v16  ;;  %v2313_v8 = vadd.f32 %v3622_v35, %v3609_v29 }
 0x9cc   :  { %v2208_v47 = vmul.f32 %v2177_v46, %v3791_v40  ;;  %v2247_v40 = vsel %vm3830_vm1, %v3016_v6, %v2243_v44 }
 0x9cd   :  { %v2181_v32 = vmul.f32 0.5, %v2180_v7  ;;  %v2161_v14 = vpop.xlane.xlu2 %2160  ;;  %v2269_v2 = vmul.f32 %v2247_v40, %v3782_v60  ;;  %v2253_v60 = vmul.f32 %v3822_v38, %v2252_v13  ;;  %v2125_v46 = vmul.f32 %v2121_v53, %v2121_v53 }
 0x9ce   :  { %v2166_v59 = vmax.f32 %v2161_v14, 1e-24  ;;  %v2272_v55 = vmul.f32 %v2268_v45, %v2208_v47  ;;  %v3182_v13 = vmov 1024.0  }
 0x9cf   :  { %v2182_v62 = vsub.f32 1.5, %v2181_v32  ;;  %v2257_v18 = vsel %vm3844_vm7, %v3822_v38, %v2253_v60  ;;  %v2122_v32 = vsub.f32 %v3789_v21, %v3806_v48  ;;  %v2314_v21 = vadd.f32 %v2313_v8, %v3615_v9 }
 0x9d0   :  { %3023 = vrsqrt.f32 %v2166_v59  ;;  %2276 = vadd.xlane.f32.xlu0 %v2272_v55  ;;  %vm2194_vm0 = vweird.f32 %v2166_v59  ;;  %v2270_v36 = vmul.f32 %v3042_v16, %v2257_v18  ;;  %v3183_v60 = vmov 512.0  }
 0x9d1   :  { %v2183_v63 = vmul.f32 %v3022_v43, %v2182_v62  ;;  %v2126_v14 = vmul.f32 %v2122_v32, %v2122_v32  ;;  %vm2338_vm7 = vcmp.eq.s32.totalorder %v3553_v27, 0 }
 0x9d3   :  { %v2187_v1 = vsel %vm2186_vm4, %v3022_v43, %v2183_v63 }
 0x9d4   :  { %v2209_v61 = vmul.f32 %v2187_v1, %v3795_v52 }
 0x9d5   :  { %v2223_v4 = vpop.xlane.xlu2 %2222  ;;  %v2163_v26 = vpop.xlane.xlu1 %2162 }
 0x9d6   :  { %v3024_v49 = vpop.eup %3023  ;;  %v2227_v15 = vmax.f32 %v2223_v4, 1e-24  ;;  %v2167_v5 = vmax.f32 %v2163_v26, 1e-24  ;;  %v2273_v11 = vmul.f32 %v2269_v2, %v2209_v61 }
 0x9d7   :  { %v2189_v10 = vmul.f32 %v3024_v49, %v2166_v59  ;;  %vm2195_vm8 = vweird.f32 %v3024_v49 }
 0x9d8   :  { %3025 = vrsqrt.f32 %v2227_v15  ;;  %2278 = vadd.xlane.f32.xlu1 %v2273_v11  ;;  %1165 = vadd.xlane.f32.xlu0 %v1158_v58  ;;  %vm2196_vm9 = vmor %vm2194_vm0, %vm2195_vm8  ;;  %vm2264_vm12 = vweird.f32 %v2227_v15  ;;  %vm2204_vm14 = vweird.f32 %v2167_v5  ;;  %vm2340_vm8 = vcmp.eq.s32.totalorder %v3553_v27, 1 }
 0x9d9   :  { %v2190_v17 = vmul.f32 %v3024_v49, %v2189_v10  ;;  %3027 = vrsqrt.f32 %v2167_v5  ;;  %vm2343_vm0 = vcmp.eq.s32.totalorder %v3553_v27, 2 }
 0x9da   :  { %3029 = vrcp.f32 %v3182_v13 }
 0x9db   :  { %v2191_v3 = vmul.f32 0.5, %v2190_v17 }
 0x9dd   :  { %v2192_v6 = vsub.f32 1.5, %v2191_v3  ;;  %v1160_v50 = vpop.xlane.xlu2 %1159  ;;  %v2130_v62 = vpop.xlane.xlu1 %2129 }
 0x9de   :  { %v3026_v12 = vpop.eup %3025 }
 0x9df   :  { %v3028_v34 = vpop.eup %3027  ;;  %v2259_v19 = vmul.f32 %v3026_v12, %v2227_v15  ;;  %v2193_v22 = vmul.f32 %v3024_v49, %v2192_v6  ;;  %vm2265_vm10 = vweird.f32 %v3026_v12 }
 0x9e0   :  { %v2199_v24 = vmul.f32 %v3028_v34, %v2167_v5  ;;  %vm2205_vm11 = vweird.f32 %v3028_v34  ;;  %vm2266_vm13 = vmor %vm2264_vm12, %vm2265_vm10 }
 0x9e1   :  { %v2260_v28 = vmul.f32 %v3026_v12, %v2259_v19  ;;  %v2197_v33 = vsel %vm2196_vm9, %v3024_v49, %v2193_v22  ;;  %vm2206_vm15 = vmor %vm2204_vm14, %vm2205_vm11 }
 0x9e2   :  { %v2200_v39 = vmul.f32 %v3028_v34, %v2199_v24  ;;  %v2210_v31 = vmul.f32 %v2197_v33, %v3799_v23 }
 0x9e3   :  { %v2261_v25 = vmul.f32 0.5, %v2260_v28 }
 0x9e4   :  { %v2201_v41 = vmul.f32 0.5, %v2200_v39  ;;  %v2274_v43 = vmul.f32 %v2270_v36, %v2210_v31 }
 0x9e5   :  { %v2262_v42 = vsub.f32 1.5, %v2261_v25  ;;  %v1164_v1 = vpop.xlane.xlu2 %1163 }
 0x9e6   :  { %v2202_v51 = vsub.f32 1.5, %v2201_v41  ;;  %2280 = vadd.xlane.f32.xlu1 %v2274_v43 }
 0x9e7   :  { %v2263_v38 = vmul.f32 %v3026_v12, %v2262_v42 }
 0x9e8   :  { %v2203_v23 = vmul.f32 %v3028_v34, %v2202_v51 }
 0x9e9   :  { %v2267_v54 = vsel %vm2266_vm13, %v3026_v12, %v2263_v38 }
 0x9ea   :  { %v2207_v30 = vsel %vm2206_vm15, %v3028_v34, %v2203_v23  ;;  %v2271_v45 = vmul.f32 %v2267_v54, %v3806_v48  ;;  %v1162_v48 = vpop.xlane.xlu0 %1161  ;;  %v3030_v34 = vpop.eup %3029 }
 0x9eb   :  { %v2211_v7 = vmul.f32 %v2207_v30, %v3808_v56  ;;  %v2315_v56 = vadd.f32 %v2314_v21, %v3625_v37  ;;  %v1167_v61 = vadd.f32 %v1162_v48, %v1160_v50  ;;  %v1178_v16 = vmul.f32 1024.0, %v3030_v34 }
 0x9ec   :  { %vm1182_vm2 = vweird.f32 %v3030_v34 }
 0x9ed   :  { %v2275_v47 = vmul.f32 %v2271_v45, %v2211_v7  ;;  %v2316_v44 = vrot.slane %v2315_v56, 4  ;;  %v1168_v26 = vadd.f32 %v1167_v61, %v1164_v1  ;;  %v1179_v23 = vsub.f32 1.0, %v1178_v16 }
 0x9ee   :  { %2131 = vadd.xlane.f32.xlu1 %v2125_v46 }
 0x9ef   :  { %2282 = vadd.xlane.f32.xlu2 %v2275_v47  ;;  %v2317_v59 = vadd.f32 %v2316_v44, %v2315_v56  ;;  %v1180_v32 = vmul.f32 %v3030_v34, %v1179_v23 }
 0x9f1   :  { %v2318_v55 = vrot.slane %v2317_v59, 2 }
 0x9f2   :  { %v2128_v57 = vpop.xlane.xlu0 %2127 }
 0x9f3   :  { %v2319_v40 = vadd.f32 %v2318_v55, %v2317_v59  ;;  %v2135_v51 = vadd.f32 %v2130_v62, %v2128_v57  ;;  %v1181_v59 = vadd.f32 %v3030_v34, %v1180_v32 }
 0x9f5   :  { %v2320_v0 = vrot.slane %v2319_v40, 1  ;;  %v1183_v61 = vsel %vm1182_vm2, %v3030_v34, %v1181_v59 }
 0x9f7   :  { %2133 = vadd.xlane.f32.xlu2 %v2126_v14  ;;  %v2321_v2 = vadd.f32 %v2320_v0, %v2319_v40 }
 0x9f9   :  { %v3870_v15 = vadd.f32 1e-12, %v2321_v2 }
 0x9fb   :  { %3031 = vrcp.f32 %v3870_v15  ;;  %vm2328_vm3 = vweird.f32 %v3870_v15  ;;  %v2332_v62 = vand.u32 2147483647, %v3870_v15 }
 0x9fc   :  { %3033 = vrcp.f32 %v3183_v60 }
 0x9fd   :  { %vm2333_vm6 = vcmp.eq.f32.partialorder %v2332_v62, 8.507059e+37 }
 0xa01   :  { %v3032_v22 = vpop.eup %3031 }
 0xa02   :  { %v3034_v24 = vpop.eup %3033  ;;  %v2324_v36 = vmul.f32 %v3032_v22, %v3870_v15  ;;  %vm2329_vm1 = vweird.f32 %v3032_v22 }
 0xa03   :  { %v2145_v42 = vmul.f32 512.0, %v3034_v24  ;;  %vm2149_vm4 = vweird.f32 %v3034_v24  ;;  %vm2330_vm5 = vmor %vm2328_vm3, %vm2329_vm1 }
 0xa04   :  { %v2325_v54 = vsub.f32 1.0, %v2324_v36 }
 0xa05   :  { %v2146_v45 = vsub.f32 1.0, %v2145_v42 }
 0xa06   :  { %v2326_v14 = vmul.f32 %v3032_v22, %v2325_v54 }
 0xa07   :  { %v2147_v48 = vmul.f32 %v3034_v24, %v2146_v45 }
 0xa09   :  { %v2148_v40 = vadd.f32 %v3034_v24, %v2147_v48 }
 0xa43   :  { %v2277_v63 = vpop.xlane.xlu0 %2276 }
 0xa44   :  { %v2284_v58 = vsub.f32 1.0, %v2277_v63  ;;  %v2334_v63 = vand.u32 2147483648, %v3870_v15 }
 0xa46   :  { %v2288_v52 = vmul.f32 %v2284_v58, %v2284_v58 }
 0xa48   :  { %v2292_v28 = vmul.f32 %v2288_v52, %v3609_v29 }
 0xa4b   :  { %v2279_v20 = vpop.xlane.xlu1 %2278  ;;  %v1166_v4 = vpop.xlane.xlu0 %1165 }
 0xa4c   :  { %v1169_v49 = vadd.f32 %v1168_v26, %v1166_v4  ;;  %v2285_v5 = vsub.f32 1.0, %v2279_v20 }
 0xa4e   :  { %v1170_v10 = vrot.slane %v1169_v49, 4  ;;  %v2289_v3 = vmul.f32 %v2285_v5, %v2285_v5  ;;  %v2150_v5 = vsel %vm2149_vm4, %v3034_v24, %v2148_v40 }
 0xa50   :  { %v1171_v6 = vadd.f32 %v1170_v10, %v1169_v49  ;;  %v2293_v19 = vmul.f32 %v2289_v3, %v3622_v35  ;;  %v2335_v49 = vor.u32 1.1754944e-38, %v2334_v63 }
 0xa52   :  { %v1172_v33 = vrot.slane %v1171_v6, 2  ;;  %v2300_v25 = vadd.f32 %v2293_v19, %v2292_v28 }
 0xa54   :  { %v1173_v38 = vadd.f32 %v1172_v33, %v1171_v6 }
 0xa59   :  { %v2281_v11 = vpop.xlane.xlu1 %2280 }
 0xa5a   :  { %v2286_v17 = vsub.f32 1.0, %v2281_v11 }
 0xa5c   :  { %v2290_v12 = vmul.f32 %v2286_v17, %v2286_v17 }
 0xa5e   :  { %v2294_v39 = vmul.f32 %v2290_v12, %v3615_v9  ;;  %v1174_v9 = vrot.slane %v1173_v38, 1 }
 0xa60   :  { %v2301_v53 = vadd.f32 %v2300_v25, %v2294_v39  ;;  %v1175_v56 = vadd.f32 %v1174_v9, %v1173_v38 }
 0xa61   :  { %v2132_v43 = vpop.xlane.xlu1 %2131 }
 0xa62   :  { %v2283_v18 = vpop.xlane.xlu2 %2282  ;;  %v2136_v29 = vadd.f32 %v2135_v51, %v2132_v43  ;;  %v1176_v0 = vmul.f32 1.25, %v1175_v56 }
 0xa63   :  { %v2287_v31 = vsub.f32 1.0, %v2283_v18 }
 0xa64   :  { %v1184_v11 = vmul.f32 %v1183_v61, %v1176_v0 }
 0xa65   :  { %v2291_v41 = vmul.f32 %v2287_v31, %v2287_v31 }
 0xa66   :  { %v2339_v17 = vsel %vm2338_vm7, %v1184_v11, 0.0 }
 0xa67   :  { %v2295_v35 = vmul.f32 %v2291_v41, %v3625_v37  ;;  %v2327_v37 = vadd.f32 %v3032_v22, %v2326_v14 }
 0xa69   :  { %v2302_v30 = vadd.f32 %v2301_v53, %v2295_v35  ;;  %v2331_v2 = vsel %vm2330_vm5, %v3032_v22, %v2327_v37 }
 0xa6a   :  { %v2134_v7 = vpop.xlane.xlu2 %2133  ;;  %v2336_v13 = vsel %vm2333_vm6, %v2335_v49, %v2331_v2 }
 0xa6b   :  { %v2303_v46 = vrot.slane %v2302_v30, 4  ;;  %v2137_v47 = vadd.f32 %v2136_v29, %v2134_v7 }
 0xa6d   :  { %v2304_v8 = vadd.f32 %v2303_v46, %v2302_v30  ;;  %v2138_v21 = vrot.slane %v2137_v47, 4 }
 0xa6f   :  { %v2305_v44 = vrot.slane %v2304_v8, 2  ;;  %v2139_v57 = vadd.f32 %v2138_v21, %v2137_v47 }
 0xa71   :  { %v2306_v55 = vadd.f32 %v2305_v44, %v2304_v8  ;;  %v2140_v50 = vrot.slane %v2139_v57, 2 }
 0xa73   :  { %v2307_v20 = vrot.slane %v2306_v55, 1  ;;  %v2141_v1 = vadd.f32 %v2140_v50, %v2139_v57 }
 0xa75   :  { %v2308_v4 = vadd.f32 %v2307_v20, %v2306_v55  ;;  %v2142_v26 = vrot.slane %v2141_v1, 1 }
 0xa77   :  { %v2143_v58 = vadd.f32 %v2142_v26, %v2141_v1  ;;  %v2337_v15 = vmul.f32 %v2336_v13, %v2308_v4 }
 0xa79   :  { %v2151_v10 = vmul.f32 %v2150_v5, %v2143_v58  ;;  %v2344_v52 = vsel %vm2343_vm0, %v2337_v15, 0.0 }
 0xa7b   :  { %v2341_v3 = vsel %vm2340_vm8, %v2151_v10, 0.0 }
 0xa7c   :  { %v2342_v60 = vadd.f32 %v2341_v3, %v2339_v17 }
 0xa7e   :  { %v2345_v6 = vadd.f32 %v2344_v52, %v2342_v60 }
 0xa80   :  { %2346 = vst [vmem:[%s3908_s21] sm:$0x1] %v2345_v6 }
 0xa81   :  { %3167 = dma.done.wait [#allocation4], 512  }
 0xa82   :  { %3168 = vsyncadd [#allocation4], 4294966784 }
 0xa83   :  { %3169 = dma.done.wait [#allocation10], 512  }
 0xa84   :  { %3170 = vsyncadd [#allocation10], 4294966784 }
 0xa85   :  { %2385 = vsyncpa [#allocation3], 1 }
 0xa86   :  { %2386 = vsyncpa [#allocation6], 1 }
 0xa87   :  { %2387 = vsyncpa [#allocation4], 1 }
 0xa88   :  { %2388 = vsyncpa [#allocation10], 1 }

</bundles_post_ra>
